<compile_context>
chip_gen: v7x
topology: tpu7x:2x2x1
jax: 0.10.0
libtpu: 0.0.40
codegen_flags: <defaults>
</compile_context>

<pallas_src>
import functools

import jax
import jax.numpy as jnp
from jax import lax
from jax.experimental import pallas as pl
from jax.experimental.pallas import tpu as pltpu


# ----------------------------------------------------------------------------
# Fused Bottleneck kernel: one (batch, row-tile) step per grid point.
# ----------------------------------------------------------------------------
def _bottleneck_kernel(x_hbm, xt_ref, w1_ref, w2_ref, w3_ref,
                       s1_ref, b1_ref, s2_ref, b2_ref, s3_ref, b3_ref,
                       ml_ref, mr_ref,
                       o_ref,
                       xhalo_ref, h1_ref, sem,
                       *, H, W, TH, Cin, Cmid, Cout, compute_dtype):
    n = pl.program_id(0)
    r = pl.program_id(1)
    nrows = pl.num_programs(1)
    not_first = r > 0
    not_last = r < nrows - 1
    row0 = pl.multiple_of(r * TH, TH)

    # ---- kick off the 1-row top/bottom halo DMAs (tiny; overlapped with the
    #      conv1 matmul on the main rows below) ------------------------------
    top_cp = pltpu.make_async_copy(
        x_hbm.at[n, pl.ds(jnp.maximum(row0 - 1, 0), 1)],
        xhalo_ref.at[pl.ds(0, 1)], sem.at[0])
    bot_cp = pltpu.make_async_copy(
        x_hbm.at[n, pl.ds(jnp.minimum(row0 + TH, H - 1), 1)],
        xhalo_ref.at[pl.ds(1, 1)], sem.at[1])

    @pl.when(not_first)
    def _():
        top_cp.start()

    @pl.when(not_last)
    def _():
        bot_cp.start()

    # ---- conv1 (1x1) + BN1 + ReLU on the TH main rows (auto-pipelined tile) --
    x_main = xt_ref[...].reshape(TH * W, Cin)
    y1 = jnp.dot(x_main.astype(compute_dtype), w1_ref[...],
                 preferred_element_type=jnp.float32)
    y1 = jnp.maximum(y1 * s1_ref[...] + b1_ref[...], 0.0)
    h1_ref[pl.ds(W, TH * W)] = y1

    # ---- conv1 on the two halo rows (SAME padding => zeros outside image) ----
    @pl.when(not_first)
    def _():
        top_cp.wait()

    @pl.when(not_last)
    def _():
        bot_cp.wait()

    xh = xhalo_ref[...].reshape(2 * W, Cin)
    yh = jnp.dot(xh.astype(compute_dtype), w1_ref[...],
                 preferred_element_type=jnp.float32)
    yh = jnp.maximum(yh * s1_ref[...] + b1_ref[...], 0.0)
    zero_row = jnp.zeros((W, Cmid), jnp.float32)
    h1_ref[pl.ds(0, W)] = jnp.where(not_first, yh[:W], zero_row)
    h1_ref[pl.ds((TH + 1) * W, W)] = jnp.where(not_last, yh[W:], zero_row)

    # ---- conv2 (3x3, pad=1, stride=1) + BN2 + ReLU ----------------------------
    # Horizontal taps: roll the whole (TH+2)*W buffer once per direction (XLU),
    # then mask the columns whose tap falls off the image.  Vertical taps are
    # aligned row slices of the same buffers.
    L = (TH + 2) * W
    h1_all = h1_ref[...]                                      # ((TH+2)*W, Cmid)
    left_all = pltpu.roll(h1_all, 1, 0) * ml_ref[...]         # reads col j-1
    right_all = pltpu.roll(h1_all, L - 1, 0) * mr_ref[...]    # reads col j+1

    acc = jnp.zeros((TH * W, Cmid), jnp.float32)
    for ky in range(3):
        off = ky * W
        taps = (left_all[off:off + TH * W],    # kx = 0
                h1_all[off:off + TH * W],      # kx = 1
                right_all[off:off + TH * W])   # kx = 2
        for kx in range(3):
            acc = acc + jnp.dot(taps[kx].astype(compute_dtype),
                                w2_ref[ky * 3 + kx],
                                preferred_element_type=jnp.float32)
    y2 = jnp.maximum(acc * s2_ref[...] + b2_ref[...], 0.0)

    # ---- conv3 (1x1) + BN3 + residual + ReLU ---------------------------------
    y3 = jnp.dot(y2.astype(compute_dtype), w3_ref[...],
                 preferred_element_type=jnp.float32)
    res = x_main.astype(jnp.float32)
    y3 = jnp.maximum(y3 * s3_ref[...] + b3_ref[...] + res, 0.0)
    o_ref[...] = y3.reshape(1, TH, W, Cout).astype(o_ref.dtype)


# ----------------------------------------------------------------------------
# Helpers
# ----------------------------------------------------------------------------
def fold_bn(gamma, beta, mean, var, eps=1e-5):
    scale = gamma / jnp.sqrt(var + eps)
    bias = beta - mean * scale
    return scale, bias


def _pick_row_tile(H, max_rows):
    for t in range(min(max_rows, H), 0, -1):
        if H % t == 0:
            return t
    return H


# ----------------------------------------------------------------------------
# Bottleneck forward (wrapper): NCHW in, NCHW out
# ----------------------------------------------------------------------------
def bottleneck_forward(x_nchw, params, *, compute_dtype=jnp.float32,
                       max_row_tile=8):
    N, C, H, W = x_nchw.shape
    w1, w2, w3 = params["w1"], params["w2"], params["w3"]
    Cin, Cmid = w1.shape
    Cout = w3.shape[1]
    assert C == Cin, "channel mismatch"
    assert Cin == Cout, ("residual add requires inplanes == planes*expansion "
                         "(downsample=None, stride=1)")
    assert W % 8 == 0, "W must be a multiple of 8"  # TODO(synk): general W

    TH = _pick_row_tile(H, max_row_tile)
    grid = (N, H // TH)
    L = (TH + 2) * W

    # NCHW -> NHWC for the TPU kernel.
    # TODO(synk): keep the surrounding model NHWC end-to-end to drop these two
    #             extra HBM passes.
    x_nhwc = jnp.transpose(x_nchw, (0, 2, 3, 1))

    s1, b1 = fold_bn(**params["bn1"])
    s2, b2 = fold_bn(**params["bn2"])
    s3, b3 = fold_bn(**params["bn3"])

    w1c = w1.astype(compute_dtype)
    w2c = w2.reshape(9, Cmid, Cmid).astype(compute_dtype)   # (ky*3+kx, Cin, Cout)
    w3c = w3.astype(compute_dtype)

    # 0/1 column masks for the horizontal 3x3 taps (built once on the host),
    # covering the full (TH+2)-row halo buffer.
    col = jnp.arange(L, dtype=jnp.int32) % W
    mask_l = (col >= 1).astype(jnp.float32).reshape(L, 1)
    mask_r = (col <= W - 2).astype(jnp.float32).reshape(L, 1)

    kernel = functools.partial(
        _bottleneck_kernel, H=H, W=W, TH=TH, Cin=Cin, Cmid=Cmid, Cout=Cout,
        compute_dtype=compute_dtype)

    # Rough per-step VMEM estimate; only raise the scoped limit when the
    # default would be exceeded (keeps v7x's smaller VMEM budget safe).
    wsize = jnp.dtype(compute_dtype).itemsize
    est = (2 * 4 * TH * W * Cin                 # double-buffered input tile
           + 2 * 4 * TH * W * Cout              # double-buffered output tile
           + 4 * 2 * W * Cin + 4 * L * Cmid     # halo + conv1 scratch
           + 2 * wsize * (Cin * Cmid + 9 * Cmid * Cmid + Cmid * Cout)
           + 4 * (4 * Cmid + 2 * Cout + 2 * L))
    compiler_kwargs = dict(dimension_semantics=("parallel", "parallel"))
    if est > 24 * 1024 * 1024:
        compiler_kwargs["vmem_limit_bytes"] = int(min(4 * est, 100 * 1024 * 1024))

    out_nhwc = pl.pallas_call(
        kernel,
        out_shape=jax.ShapeDtypeStruct((N, H, W, Cout), jnp.float32),
        grid=grid,
        in_specs=[
            pl.BlockSpec(memory_space=pl.ANY),                       # x in HBM (halo DMAs)
            pl.BlockSpec((1, TH, W, Cin), lambda n, r: (n, r, 0, 0)),  # x row tile
            pl.BlockSpec((Cin, Cmid), lambda n, r: (0, 0)),          # w1
            pl.BlockSpec((9, Cmid, Cmid), lambda n, r: (0, 0, 0)),   # w2 taps
            pl.BlockSpec((Cmid, Cout), lambda n, r: (0, 0)),         # w3
            pl.BlockSpec((1, Cmid), lambda n, r: (0, 0)),            # bn1 scale
            pl.BlockSpec((1, Cmid), lambda n, r: (0, 0)),            # bn1 bias
            pl.BlockSpec((1, Cmid), lambda n, r: (0, 0)),            # bn2 scale
            pl.BlockSpec((1, Cmid), lambda n, r: (0, 0)),            # bn2 bias
            pl.BlockSpec((1, Cout), lambda n, r: (0, 0)),            # bn3 scale
            pl.BlockSpec((1, Cout), lambda n, r: (0, 0)),            # bn3 bias
            pl.BlockSpec((L, 1), lambda n, r: (0, 0)),               # left-tap mask
            pl.BlockSpec((L, 1), lambda n, r: (0, 0)),               # right-tap mask
        ],
        out_specs=pl.BlockSpec((1, TH, W, Cout), lambda n, r: (n, r, 0, 0)),
        scratch_shapes=[
            pltpu.VMEM((2, W, Cin), x_nhwc.dtype),      # top/bottom halo rows
            pltpu.VMEM((L, Cmid), jnp.float32),         # conv1/bn1/relu output
            pltpu.SemaphoreType.DMA((2,)),
        ],
        compiler_params=pltpu.CompilerParams(**compiler_kwargs),
    )(x_nhwc, x_nhwc, w1c, w2c, w3c,
      s1.reshape(1, Cmid), b1.reshape(1, Cmid),
      s2.reshape(1, Cmid), b2.reshape(1, Cmid),
      s3.reshape(1, Cout), b3.reshape(1, Cout),
      mask_l, mask_r)
    return jnp.transpose(out_nhwc, (0, 3, 1, 2))


# ----------------------------------------------------------------------------
# Parameter setup (deterministic, shapes from Bottleneck.__init__)
# ----------------------------------------------------------------------------
def init_params(key, inplanes, planes):
    kw, kbn = jax.random.split(key, 2)
    kw1, kw2, kw3 = jax.random.split(kw, 3)
    kbn1, kbn2, kbn3 = jax.random.split(kbn, 3)

    def bn_params(k, c):
        kg, kb, km, kv = jax.random.split(k, 4)
        return dict(
            gamma=1.0 + 0.1 * jax.random.normal(kg, (c,), jnp.float32),
            beta=0.1 * jax.random.normal(kb, (c,), jnp.float32),
            mean=0.1 * jax.random.normal(km, (c,), jnp.float32),
            var=jnp.abs(jax.random.normal(kv, (c,), jnp.float32)) + 0.5,
        )

    return {
        # 1x1 convs as (Cin, Cout); 3x3 conv as HWIO.
        "w1": 0.1 * jax.random.normal(kw1, (inplanes, planes), jnp.float32),
        "w2": 0.1 * jax.random.normal(kw2, (3, 3, planes, planes), jnp.float32),
        "w3": 0.1 * jax.random.normal(kw3, (planes, planes * 4), jnp.float32),
        "bn1": bn_params(kbn1, planes),
        "bn2": bn_params(kbn2, planes),
        "bn3": bn_params(kbn3, planes * 4),
    }


# ----------------------------------------------------------------------------
# Pure-JAX reference (for numerical verification)
# ----------------------------------------------------------------------------
def bottleneck_reference(x_nchw, params):
    x = jnp.transpose(x_nchw, (0, 2, 3, 1))
    s1, b1 = fold_bn(**params["bn1"])
    s2, b2 = fold_bn(**params["bn2"])
    s3, b3 = fold_bn(**params["bn3"])
    dn = ("NHWC", "HWIO", "NHWC")
    hp = lax.Precision.HIGHEST

    out = lax.conv_general_dilated(x, params["w1"][None, None], (1, 1), "SAME",
                                   dimension_numbers=dn, precision=hp)
    out = jnp.maximum(out * s1 + b1, 0.0)
    out = lax.conv_general_dilated(out, params["w2"], (1, 1), "SAME",
                                   dimension_numbers=dn, precision=hp)
    out = jnp.maximum(out * s2 + b2, 0.0)
    out = lax.conv_general_dilated(out, params["w3"][None, None], (1, 1), "SAME",
                                   dimension_numbers=dn, precision=hp)
    out = jnp.maximum(out * s3 + b3 + x, 0.0)
    return jnp.transpose(out, (0, 3, 1, 2))


if __name__ == "__main__":
    key = jax.random.PRNGKey(0)
    kx_, kp = jax.random.split(key)

    # Small shapes consistent with the module: inplanes = planes * expansion.
    N, planes, H, W = 2, 4, 16, 16
    inplanes = planes * 4  # 16
    x = jax.random.normal(kx_, (N, inplanes, H, W), jnp.float32)
    params = init_params(kp, inplanes, planes)

    ref = jax.block_until_ready(bottleneck_reference(x, params))

    # f32 matmul path: check against the reference.
    out = jax.block_until_ready(
        bottleneck_forward(x, params, compute_dtype=jnp.float32))
    assert out.shape == (N, planes * 4, H, W), out.shape
    err = float(jnp.max(jnp.abs(out - ref)))
    assert err < 2e-2, f"f32 path max abs err {err}"

    # bf16 matmul path: f32 accumulation/epilogue, loose check.
    out_bf16 = jax.block_until_ready(
        bottleneck_forward(x, params, compute_dtype=jnp.bfloat16))
    err_bf = float(jnp.max(jnp.abs(out_bf16 - ref)))
    assert err_bf < 0.3, f"bf16 path max abs err {err_bf}"

    print("KERNEL_OK")
</pallas_src>

<mosaic_0001>
module attributes {stable_mosaic.version = 11 : i64} {
  func.func @_bottleneck_kernel(%arg0: i32, %arg1: i32, %arg2: memref<2x16x16x16xf32, #tpu.memory_space<any>>, %arg3: memref<1x8x16x16xf32, #tpu.memory_space<vmem>>, %arg4: memref<16x4xf32, #tpu.memory_space<vmem>>, %arg5: memref<9x4x4xf32, #tpu.memory_space<vmem>>, %arg6: memref<4x16xf32, #tpu.memory_space<vmem>>, %arg7: memref<1x4xf32, #tpu.memory_space<vmem>>, %arg8: memref<1x4xf32, #tpu.memory_space<vmem>>, %arg9: memref<1x4xf32, #tpu.memory_space<vmem>>, %arg10: memref<1x4xf32, #tpu.memory_space<vmem>>, %arg11: memref<1x16xf32, #tpu.memory_space<vmem>>, %arg12: memref<1x16xf32, #tpu.memory_space<vmem>>, %arg13: memref<160x1xf32, #tpu.memory_space<vmem>>, %arg14: memref<160x1xf32, #tpu.memory_space<vmem>>, %arg15: memref<1x8x16x16xf32, #tpu.memory_space<vmem>>, %arg16: memref<2x16x16xf32, #tpu.memory_space<vmem>>, %arg17: memref<160x4xf32, #tpu.memory_space<vmem>>, %arg18: memref<2x!tpu.dma_semaphore, #tpu.memory_space<semaphore_mem>>) attributes {dimension_semantics = [#tpu.dimension_semantics<parallel>, #tpu.dimension_semantics<parallel>], iteration_bounds = array<i64: 2, 2>, scalar_prefetch = 0 : i64, scratch_operands = 3 : i64, tpu.core_type = #tpu.core_type<tc>, window_params = [{}, {transform_indices = @transform_1, window_bounds = array<i64: 1, 8, 16, 16>}, {pipeline_mode = #tpu.pipeline_mode<synchronous>, transform_indices = @transform_2, window_bounds = array<i64: 16, 4>}, {pipeline_mode = #tpu.pipeline_mode<synchronous>, transform_indices = @transform_3, window_bounds = array<i64: 9, 4, 4>}, {pipeline_mode = #tpu.pipeline_mode<synchronous>, transform_indices = @transform_4, window_bounds = array<i64: 4, 16>}, {pipeline_mode = #tpu.pipeline_mode<synchronous>, transform_indices = @transform_5, window_bounds = array<i64: 1, 4>}, {pipeline_mode = #tpu.pipeline_mode<synchronous>, transform_indices = @transform_6, window_bounds = array<i64: 1, 4>}, {pipeline_mode = #tpu.pipeline_mode<synchronous>, transform_indices = @transform_7, window_bounds = array<i64: 1, 4>}, {pipeline_mode = #tpu.pipeline_mode<synchronous>, transform_indices = @transform_8, window_bounds = array<i64: 1, 4>}, {pipeline_mode = #tpu.pipeline_mode<synchronous>, transform_indices = @transform_9, window_bounds = array<i64: 1, 16>}, {pipeline_mode = #tpu.pipeline_mode<synchronous>, transform_indices = @transform_10, window_bounds = array<i64: 1, 16>}, {pipeline_mode = #tpu.pipeline_mode<synchronous>, transform_indices = @transform_11, window_bounds = array<i64: 160, 1>}, {pipeline_mode = #tpu.pipeline_mode<synchronous>, transform_indices = @transform_12, window_bounds = array<i64: 160, 1>}, {transform_indices = @transform_13, window_bounds = array<i64: 1, 8, 16, 16>}]} {
    %c0_i32 = arith.constant 0 : i32
    %0 = arith.cmpi sgt, %arg1, %c0_i32 : i32
    %c1_i32 = arith.constant 1 : i32
    %1 = arith.cmpi slt, %arg1, %c1_i32 : i32
    %c8_i32 = arith.constant 8 : i32
    %2 = arith.muli %arg1, %c8_i32 : i32
    %3 = tpu.assume_multiple %2, 8 : i32
    %c1_i32_0 = arith.constant 1 : i32
    %4 = arith.subi %3, %c1_i32_0 : i32
    %c0_i32_1 = arith.constant 0 : i32
    %5 = arith.maxsi %4, %c0_i32_1 : i32
    %c8_i32_2 = arith.constant 8 : i32
    %6 = arith.addi %3, %c8_i32_2 : i32
    %c15_i32 = arith.constant 15 : i32
    %7 = arith.minsi %6, %c15_i32 : i32
    %8 = arith.extui %0 : i1 to i32
    %c0_i32_3 = arith.constant 0 : i32
    %c0_i32_4 = arith.constant 0 : i32
    %9 = arith.cmpi ne, %8, %c0_i32_4 : i32
    scf.if %9 {
      %c0_i32_90 = arith.constant 0 : i32
      %c0_i32_91 = arith.constant 0 : i32
      %124 = tpu.memref_slice %arg2[%arg0, %5, %c0_i32_90, %c0_i32_91] : memref<2x16x16x16xf32, #tpu.memory_space<any>> -> memref<1x1x16x16xf32, #tpu.memory_space<any>>
      %125 = tpu.memref_squeeze %124 : memref<1x1x16x16xf32, #tpu.memory_space<any>> -> memref<1x16x16xf32, #tpu.memory_space<any>>
      %c0_i32_92 = arith.constant 0 : i32
      %c0_i32_93 = arith.constant 0 : i32
      %c0_i32_94 = arith.constant 0 : i32
      %126 = tpu.memref_slice %arg16[%c0_i32_92, %c0_i32_93, %c0_i32_94] : memref<2x16x16xf32, #tpu.memory_space<vmem>> -> memref<1x16x16xf32, #tpu.memory_space<vmem>>
      %127 = tpu.memref_slice %arg18[%c0_i32_3] : memref<2x!tpu.dma_semaphore, #tpu.memory_space<semaphore_mem>> -> memref<1x!tpu.dma_semaphore, #tpu.memory_space<semaphore_mem>>
      %128 = tpu.memref_squeeze %127 : memref<1x!tpu.dma_semaphore, #tpu.memory_space<semaphore_mem>> -> memref<!tpu.dma_semaphore, #tpu.memory_space<semaphore_mem>>
      tpu.enqueue_dma source(%125 : memref<1x16x16xf32, #tpu.memory_space<any>>) target(%126 : memref<1x16x16xf32, #tpu.memory_space<vmem>>) target_semaphore(%128 : memref<!tpu.dma_semaphore, #tpu.memory_space<semaphore_mem>>)
    } else {
    }
    %10 = arith.extui %1 : i1 to i32
    %c1_i32_5 = arith.constant 1 : i32
    %c0_i32_6 = arith.constant 0 : i32
    %11 = arith.cmpi ne, %10, %c0_i32_6 : i32
    scf.if %11 {
      %c0_i32_90 = arith.constant 0 : i32
      %c0_i32_91 = arith.constant 0 : i32
      %124 = tpu.memref_slice %arg2[%arg0, %7, %c0_i32_90, %c0_i32_91] : memref<2x16x16x16xf32, #tpu.memory_space<any>> -> memref<1x1x16x16xf32, #tpu.memory_space<any>>
      %125 = tpu.memref_squeeze %124 : memref<1x1x16x16xf32, #tpu.memory_space<any>> -> memref<1x16x16xf32, #tpu.memory_space<any>>
      %c1_i32_92 = arith.constant 1 : i32
      %c0_i32_93 = arith.constant 0 : i32
      %c0_i32_94 = arith.constant 0 : i32
      %126 = tpu.memref_slice %arg16[%c1_i32_92, %c0_i32_93, %c0_i32_94] : memref<2x16x16xf32, #tpu.memory_space<vmem>> -> memref<1x16x16xf32, #tpu.memory_space<vmem>>
      %127 = tpu.memref_slice %arg18[%c1_i32_5] : memref<2x!tpu.dma_semaphore, #tpu.memory_space<semaphore_mem>> -> memref<1x!tpu.dma_semaphore, #tpu.memory_space<semaphore_mem>>
      %128 = tpu.memref_squeeze %127 : memref<1x!tpu.dma_semaphore, #tpu.memory_space<semaphore_mem>> -> memref<!tpu.dma_semaphore, #tpu.memory_space<semaphore_mem>>
      tpu.enqueue_dma source(%125 : memref<1x16x16xf32, #tpu.memory_space<any>>) target(%126 : memref<1x16x16xf32, #tpu.memory_space<vmem>>) target_semaphore(%128 : memref<!tpu.dma_semaphore, #tpu.memory_space<semaphore_mem>>)
    } else {
    }
    %c0 = arith.constant 0 : index
    %c0_7 = arith.constant 0 : index
    %c0_8 = arith.constant 0 : index
    %c0_9 = arith.constant 0 : index
    %12 = vector.load %arg3[%c0, %c0_7, %c0_8, %c0_9] : memref<1x8x16x16xf32, #tpu.memory_space<vmem>>, vector<1x8x16x16xf32>
    %13 = vector.shape_cast %12 : vector<1x8x16x16xf32> to vector<128x16xf32>
    %c0_10 = arith.constant 0 : index
    %c0_11 = arith.constant 0 : index
    %14 = vector.load %arg4[%c0_10, %c0_11] : memref<16x4xf32, #tpu.memory_space<vmem>>, vector<16x4xf32>
    %cst = arith.constant dense<0.000000e+00> : vector<128x4xf32>
    %15 = tpu.matmul %13, %14, %cst {dimension_numbers = #tpu.dot_dimension_numbers<[1], [0], [0], [1], [0, 0, 1, 1], [], []>} : vector<128x16xf32>, vector<16x4xf32>, vector<128x4xf32> -> vector<128x4xf32>
    %c0_12 = arith.constant 0 : index
    %c0_13 = arith.constant 0 : index
    %16 = vector.load %arg7[%c0_12, %c0_13] : memref<1x4xf32, #tpu.memory_space<vmem>>, vector<1x4xf32>
    %17 = vector.broadcast %16 : vector<1x4xf32> to vector<128x4xf32>
    %18 = arith.mulf %15, %17 : vector<128x4xf32>
    %c0_14 = arith.constant 0 : index
    %c0_15 = arith.constant 0 : index
    %19 = vector.load %arg8[%c0_14, %c0_15] : memref<1x4xf32, #tpu.memory_space<vmem>>, vector<1x4xf32>
    %20 = vector.broadcast %19 : vector<1x4xf32> to vector<128x4xf32>
    %21 = arith.addf %18, %20 : vector<128x4xf32>
    %cst_16 = arith.constant 0.000000e+00 : f32
    %22 = vector.broadcast %cst_16 : f32 to vector<128x4xf32>
    %23 = arith.maximumf %21, %22 : vector<128x4xf32>
    %c16 = arith.constant 16 : index
    %c0_17 = arith.constant 0 : index
    %24 = vector.load %arg17[%c16, %c0_17] : memref<160x4xf32, #tpu.memory_space<vmem>>, vector<128x4xf32>
    tpu.vector_store %arg17[%c16, %c0_17], %23 {strides = array<i32>} : memref<160x4xf32, #tpu.memory_space<vmem>>, vector<128x4xf32>,
    %25 = arith.extui %0 : i1 to i32
    %c0_i32_18 = arith.constant 0 : i32
    %c0_i32_19 = arith.constant 0 : i32
    %26 = arith.cmpi ne, %25, %c0_i32_19 : i32
    scf.if %26 {
      %c0_i32_90 = arith.constant 0 : i32
      %c0_i32_91 = arith.constant 0 : i32
      %124 = tpu.memref_slice %arg2[%arg0, %5, %c0_i32_90, %c0_i32_91] : memref<2x16x16x16xf32, #tpu.memory_space<any>> -> memref<1x1x16x16xf32, #tpu.memory_space<any>>
      %125 = tpu.memref_squeeze %124 : memref<1x1x16x16xf32, #tpu.memory_space<any>> -> memref<1x16x16xf32, #tpu.memory_space<any>>
      %c0_i32_92 = arith.constant 0 : i32
      %c0_i32_93 = arith.constant 0 : i32
      %c0_i32_94 = arith.constant 0 : i32
      %126 = tpu.memref_slice %arg16[%c0_i32_92, %c0_i32_93, %c0_i32_94] : memref<2x16x16xf32, #tpu.memory_space<vmem>> -> memref<1x16x16xf32, #tpu.memory_space<vmem>>
      %127 = tpu.memref_slice %arg18[%c0_i32_18] : memref<2x!tpu.dma_semaphore, #tpu.memory_space<semaphore_mem>> -> memref<1x!tpu.dma_semaphore, #tpu.memory_space<semaphore_mem>>
      %128 = tpu.memref_squeeze %127 : memref<1x!tpu.dma_semaphore, #tpu.memory_space<semaphore_mem>> -> memref<!tpu.dma_semaphore, #tpu.memory_space<semaphore_mem>>
      tpu.wait_dma2 semaphore(%128 : memref<!tpu.dma_semaphore, #tpu.memory_space<semaphore_mem>>) src(%125 : memref<1x16x16xf32, #tpu.memory_space<any>>) dst(%126 : memref<1x16x16xf32, #tpu.memory_space<vmem>>)
    } else {
    }
    %27 = arith.extui %1 : i1 to i32
    %c1_i32_20 = arith.constant 1 : i32
    %c0_i32_21 = arith.constant 0 : i32
    %28 = arith.cmpi ne, %27, %c0_i32_21 : i32
    scf.if %28 {
      %c0_i32_90 = arith.constant 0 : i32
      %c0_i32_91 = arith.constant 0 : i32
      %124 = tpu.memref_slice %arg2[%arg0, %7, %c0_i32_90, %c0_i32_91] : memref<2x16x16x16xf32, #tpu.memory_space<any>> -> memref<1x1x16x16xf32, #tpu.memory_space<any>>
      %125 = tpu.memref_squeeze %124 : memref<1x1x16x16xf32, #tpu.memory_space<any>> -> memref<1x16x16xf32, #tpu.memory_space<any>>
      %c1_i32_92 = arith.constant 1 : i32
      %c0_i32_93 = arith.constant 0 : i32
      %c0_i32_94 = arith.constant 0 : i32
      %126 = tpu.memref_slice %arg16[%c1_i32_92, %c0_i32_93, %c0_i32_94] : memref<2x16x16xf32, #tpu.memory_space<vmem>> -> memref<1x16x16xf32, #tpu.memory_space<vmem>>
      %127 = tpu.memref_slice %arg18[%c1_i32_20] : memref<2x!tpu.dma_semaphore, #tpu.memory_space<semaphore_mem>> -> memref<1x!tpu.dma_semaphore, #tpu.memory_space<semaphore_mem>>
      %128 = tpu.memref_squeeze %127 : memref<1x!tpu.dma_semaphore, #tpu.memory_space<semaphore_mem>> -> memref<!tpu.dma_semaphore, #tpu.memory_space<semaphore_mem>>
      tpu.wait_dma2 semaphore(%128 : memref<!tpu.dma_semaphore, #tpu.memory_space<semaphore_mem>>) src(%125 : memref<1x16x16xf32, #tpu.memory_space<any>>) dst(%126 : memref<1x16x16xf32, #tpu.memory_space<vmem>>)
    } else {
    }
    %c0_22 = arith.constant 0 : index
    %c0_23 = arith.constant 0 : index
    %c0_24 = arith.constant 0 : index
    %29 = vector.load %arg16[%c0_22, %c0_23, %c0_24] : memref<2x16x16xf32, #tpu.memory_space<vmem>>, vector<2x16x16xf32>
    %30 = vector.shape_cast %29 : vector<2x16x16xf32> to vector<32x16xf32>
    %c0_25 = arith.constant 0 : index
    %c0_26 = arith.constant 0 : index
    %31 = vector.load %arg4[%c0_25, %c0_26] : memref<16x4xf32, #tpu.memory_space<vmem>>, vector<16x4xf32>
    %cst_27 = arith.constant dense<0.000000e+00> : vector<32x4xf32>
    %32 = tpu.matmul %30, %31, %cst_27 {dimension_numbers = #tpu.dot_dimension_numbers<[1], [0], [0], [1], [0, 0, 1, 1], [], []>} : vector<32x16xf32>, vector<16x4xf32>, vector<32x4xf32> -> vector<32x4xf32>
    %c0_28 = arith.constant 0 : index
    %c0_29 = arith.constant 0 : index
    %33 = vector.load %arg7[%c0_28, %c0_29] : memref<1x4xf32, #tpu.memory_space<vmem>>, vector<1x4xf32>
    %34 = vector.broadcast %33 : vector<1x4xf32> to vector<32x4xf32>
    %35 = arith.mulf %32, %34 : vector<32x4xf32>
    %c0_30 = arith.constant 0 : index
    %c0_31 = arith.constant 0 : index
    %36 = vector.load %arg8[%c0_30, %c0_31] : memref<1x4xf32, #tpu.memory_space<vmem>>, vector<1x4xf32>
    %37 = vector.broadcast %36 : vector<1x4xf32> to vector<32x4xf32>
    %38 = arith.addf %35, %37 : vector<32x4xf32>
    %cst_32 = arith.constant 0.000000e+00 : f32
    %39 = vector.broadcast %cst_32 : f32 to vector<32x4xf32>
    %40 = arith.maximumf %38, %39 : vector<32x4xf32>
    %cst_33 = arith.constant 0.000000e+00 : f32
    %41 = vector.broadcast %cst_33 : f32 to vector<16x4xf32>
    %42 = vector.extract_strided_slice %40 {offsets = [0, 0], sizes = [16, 4], strides = [1, 1]} : vector<32x4xf32> to vector<16x4xf32>
    %43 = arith.select %0, %42, %41 : vector<16x4xf32>
    %c0_34 = arith.constant 0 : index
    %c0_35 = arith.constant 0 : index
    %44 = vector.load %arg17[%c0_34, %c0_35] : memref<160x4xf32, #tpu.memory_space<vmem>>, vector<16x4xf32>
    tpu.vector_store %arg17[%c0_34, %c0_35], %43 {strides = array<i32>} : memref<160x4xf32, #tpu.memory_space<vmem>>, vector<16x4xf32>,
    %45 = vector.extract_strided_slice %40 {offsets = [16, 0], sizes = [16, 4], strides = [1, 1]} : vector<32x4xf32> to vector<16x4xf32>
    %46 = arith.select %1, %45, %41 : vector<16x4xf32>
    %c144 = arith.constant 144 : index
    %c0_36 = arith.constant 0 : index
    %47 = vector.load %arg17[%c144, %c0_36] : memref<160x4xf32, #tpu.memory_space<vmem>>, vector<16x4xf32>
    tpu.vector_store %arg17[%c144, %c0_36], %46 {strides = array<i32>} : memref<160x4xf32, #tpu.memory_space<vmem>>, vector<16x4xf32>,
    %c0_37 = arith.constant 0 : index
    %c0_38 = arith.constant 0 : index
    %48 = vector.load %arg17[%c0_37, %c0_38] : memref<160x4xf32, #tpu.memory_space<vmem>>, vector<160x4xf32>
    %c1_i32_39 = arith.constant 1 : i32
    %49 = tpu.dynamic_rotate %48 by %c1_i32_39 dim 0 : vector<160x4xf32>, i32 -> vector<160x4xf32>
    %c0_40 = arith.constant 0 : index
    %c0_41 = arith.constant 0 : index
    %50 = vector.load %arg13[%c0_40, %c0_41] : memref<160x1xf32, #tpu.memory_space<vmem>>, vector<160x1xf32>
    %51 = vector.broadcast %50 : vector<160x1xf32> to vector<160x4xf32>
    %52 = arith.mulf %49, %51 : vector<160x4xf32>
    %c159_i32 = arith.constant 159 : i32
    %53 = tpu.dynamic_rotate %48 by %c159_i32 dim 0 : vector<160x4xf32>, i32 -> vector<160x4xf32>
    %c0_42 = arith.constant 0 : index
    %c0_43 = arith.constant 0 : index
    %54 = vector.load %arg14[%c0_42, %c0_43] : memref<160x1xf32, #tpu.memory_space<vmem>>, vector<160x1xf32>
    %55 = vector.broadcast %54 : vector<160x1xf32> to vector<160x4xf32>
    %56 = arith.mulf %53, %55 : vector<160x4xf32>
    %cst_44 = arith.constant 0.000000e+00 : f32
    %57 = vector.broadcast %cst_44 : f32 to vector<128x4xf32>
    %58 = vector.extract_strided_slice %52 {offsets = [0, 0], sizes = [128, 4], strides = [1, 1]} : vector<160x4xf32> to vector<128x4xf32>
    %59 = vector.extract_strided_slice %48 {offsets = [0, 0], sizes = [128, 4], strides = [1, 1]} : vector<160x4xf32> to vector<128x4xf32>
    %60 = vector.extract_strided_slice %56 {offsets = [0, 0], sizes = [128, 4], strides = [1, 1]} : vector<160x4xf32> to vector<128x4xf32>
    %c0_45 = arith.constant 0 : index
    %c0_46 = arith.constant 0 : index
    %c0_47 = arith.constant 0 : index
    %61 = vector.load %arg5[%c0_45, %c0_46, %c0_47] : memref<9x4x4xf32, #tpu.memory_space<vmem>>, vector<1x4x4xf32>
    %62 = vector.shape_cast %61 : vector<1x4x4xf32> to vector<4x4xf32>
    %cst_48 = arith.constant dense<0.000000e+00> : vector<128x4xf32>
    %63 = tpu.matmul %58, %62, %cst_48 {dimension_numbers = #tpu.dot_dimension_numbers<[1], [0], [0], [1], [0, 0, 1, 1], [], []>} : vector<128x4xf32>, vector<4x4xf32>, vector<128x4xf32> -> vector<128x4xf32>
    %64 = arith.addf %57, %63 : vector<128x4xf32>
    %c1 = arith.constant 1 : index
    %c0_49 = arith.constant 0 : index
    %c0_50 = arith.constant 0 : index
    %65 = vector.load %arg5[%c1, %c0_49, %c0_50] : memref<9x4x4xf32, #tpu.memory_space<vmem>>, vector<1x4x4xf32>
    %66 = vector.shape_cast %65 : vector<1x4x4xf32> to vector<4x4xf32>
    %cst_51 = arith.constant dense<0.000000e+00> : vector<128x4xf32>
    %67 = tpu.matmul %59, %66, %cst_51 {dimension_numbers = #tpu.dot_dimension_numbers<[1], [0], [0], [1], [0, 0, 1, 1], [], []>} : vector<128x4xf32>, vector<4x4xf32>, vector<128x4xf32> -> vector<128x4xf32>
    %68 = arith.addf %64, %67 : vector<128x4xf32>
    %c2 = arith.constant 2 : index
    %c0_52 = arith.constant 0 : index
    %c0_53 = arith.constant 0 : index
    %69 = vector.load %arg5[%c2, %c0_52, %c0_53] : memref<9x4x4xf32, #tpu.memory_space<vmem>>, vector<1x4x4xf32>
    %70 = vector.shape_cast %69 : vector<1x4x4xf32> to vector<4x4xf32>
    %cst_54 = arith.constant dense<0.000000e+00> : vector<128x4xf32>
    %71 = tpu.matmul %60, %70, %cst_54 {dimension_numbers = #tpu.dot_dimension_numbers<[1], [0], [0], [1], [0, 0, 1, 1], [], []>} : vector<128x4xf32>, vector<4x4xf32>, vector<128x4xf32> -> vector<128x4xf32>
    %72 = arith.addf %68, %71 : vector<128x4xf32>
    %73 = vector.extract_strided_slice %52 {offsets = [16, 0], sizes = [128, 4], strides = [1, 1]} : vector<160x4xf32> to vector<128x4xf32>
    %74 = vector.extract_strided_slice %48 {offsets = [16, 0], sizes = [128, 4], strides = [1, 1]} : vector<160x4xf32> to vector<128x4xf32>
    %75 = vector.extract_strided_slice %56 {offsets = [16, 0], sizes = [128, 4], strides = [1, 1]} : vector<160x4xf32> to vector<128x4xf32>
    %c3 = arith.constant 3 : index
    %c0_55 = arith.constant 0 : index
    %c0_56 = arith.constant 0 : index
    %76 = vector.load %arg5[%c3, %c0_55, %c0_56] : memref<9x4x4xf32, #tpu.memory_space<vmem>>, vector<1x4x4xf32>
    %77 = vector.shape_cast %76 : vector<1x4x4xf32> to vector<4x4xf32>
    %cst_57 = arith.constant dense<0.000000e+00> : vector<128x4xf32>
    %78 = tpu.matmul %73, %77, %cst_57 {dimension_numbers = #tpu.dot_dimension_numbers<[1], [0], [0], [1], [0, 0, 1, 1], [], []>} : vector<128x4xf32>, vector<4x4xf32>, vector<128x4xf32> -> vector<128x4xf32>
    %79 = arith.addf %72, %78 : vector<128x4xf32>
    %c4 = arith.constant 4 : index
    %c0_58 = arith.constant 0 : index
    %c0_59 = arith.constant 0 : index
    %80 = vector.load %arg5[%c4, %c0_58, %c0_59] : memref<9x4x4xf32, #tpu.memory_space<vmem>>, vector<1x4x4xf32>
    %81 = vector.shape_cast %80 : vector<1x4x4xf32> to vector<4x4xf32>
    %cst_60 = arith.constant dense<0.000000e+00> : vector<128x4xf32>
    %82 = tpu.matmul %74, %81, %cst_60 {dimension_numbers = #tpu.dot_dimension_numbers<[1], [0], [0], [1], [0, 0, 1, 1], [], []>} : vector<128x4xf32>, vector<4x4xf32>, vector<128x4xf32> -> vector<128x4xf32>
    %83 = arith.addf %79, %82 : vector<128x4xf32>
    %c5 = arith.constant 5 : index
    %c0_61 = arith.constant 0 : index
    %c0_62 = arith.constant 0 : index
    %84 = vector.load %arg5[%c5, %c0_61, %c0_62] : memref<9x4x4xf32, #tpu.memory_space<vmem>>, vector<1x4x4xf32>
    %85 = vector.shape_cast %84 : vector<1x4x4xf32> to vector<4x4xf32>
    %cst_63 = arith.constant dense<0.000000e+00> : vector<128x4xf32>
    %86 = tpu.matmul %75, %85, %cst_63 {dimension_numbers = #tpu.dot_dimension_numbers<[1], [0], [0], [1], [0, 0, 1, 1], [], []>} : vector<128x4xf32>, vector<4x4xf32>, vector<128x4xf32> -> vector<128x4xf32>
    %87 = arith.addf %83, %86 : vector<128x4xf32>
    %88 = vector.extract_strided_slice %52 {offsets = [32, 0], sizes = [128, 4], strides = [1, 1]} : vector<160x4xf32> to vector<128x4xf32>
    %89 = vector.extract_strided_slice %48 {offsets = [32, 0], sizes = [128, 4], strides = [1, 1]} : vector<160x4xf32> to vector<128x4xf32>
    %90 = vector.extract_strided_slice %56 {offsets = [32, 0], sizes = [128, 4], strides = [1, 1]} : vector<160x4xf32> to vector<128x4xf32>
    %c6 = arith.constant 6 : index
    %c0_64 = arith.constant 0 : index
    %c0_65 = arith.constant 0 : index
    %91 = vector.load %arg5[%c6, %c0_64, %c0_65] : memref<9x4x4xf32, #tpu.memory_space<vmem>>, vector<1x4x4xf32>
    %92 = vector.shape_cast %91 : vector<1x4x4xf32> to vector<4x4xf32>
    %cst_66 = arith.constant dense<0.000000e+00> : vector<128x4xf32>
    %93 = tpu.matmul %88, %92, %cst_66 {dimension_numbers = #tpu.dot_dimension_numbers<[1], [0], [0], [1], [0, 0, 1, 1], [], []>} : vector<128x4xf32>, vector<4x4xf32>, vector<128x4xf32> -> vector<128x4xf32>
    %94 = arith.addf %87, %93 : vector<128x4xf32>
    %c7 = arith.constant 7 : index
    %c0_67 = arith.constant 0 : index
    %c0_68 = arith.constant 0 : index
    %95 = vector.load %arg5[%c7, %c0_67, %c0_68] : memref<9x4x4xf32, #tpu.memory_space<vmem>>, vector<1x4x4xf32>
    %96 = vector.shape_cast %95 : vector<1x4x4xf32> to vector<4x4xf32>
    %cst_69 = arith.constant dense<0.000000e+00> : vector<128x4xf32>
    %97 = tpu.matmul %89, %96, %cst_69 {dimension_numbers = #tpu.dot_dimension_numbers<[1], [0], [0], [1], [0, 0, 1, 1], [], []>} : vector<128x4xf32>, vector<4x4xf32>, vector<128x4xf32> -> vector<128x4xf32>
    %98 = arith.addf %94, %97 : vector<128x4xf32>
    %c8 = arith.constant 8 : index
    %c0_70 = arith.constant 0 : index
    %c0_71 = arith.constant 0 : index
    %99 = vector.load %arg5[%c8, %c0_70, %c0_71] : memref<9x4x4xf32, #tpu.memory_space<vmem>>, vector<1x4x4xf32>
    %100 = vector.shape_cast %99 : vector<1x4x4xf32> to vector<4x4xf32>
    %cst_72 = arith.constant dense<0.000000e+00> : vector<128x4xf32>
    %101 = tpu.matmul %90, %100, %cst_72 {dimension_numbers = #tpu.dot_dimension_numbers<[1], [0], [0], [1], [0, 0, 1, 1], [], []>} : vector<128x4xf32>, vector<4x4xf32>, vector<128x4xf32> -> vector<128x4xf32>
    %102 = arith.addf %98, %101 : vector<128x4xf32>
    %c0_73 = arith.constant 0 : index
    %c0_74 = arith.constant 0 : index
    %103 = vector.load %arg9[%c0_73, %c0_74] : memref<1x4xf32, #tpu.memory_space<vmem>>, vector<1x4xf32>
    %104 = vector.broadcast %103 : vector<1x4xf32> to vector<128x4xf32>
    %105 = arith.mulf %102, %104 : vector<128x4xf32>
    %c0_75 = arith.constant 0 : index
    %c0_76 = arith.constant 0 : index
    %106 = vector.load %arg10[%c0_75, %c0_76] : memref<1x4xf32, #tpu.memory_space<vmem>>, vector<1x4xf32>
    %107 = vector.broadcast %106 : vector<1x4xf32> to vector<128x4xf32>
    %108 = arith.addf %105, %107 : vector<128x4xf32>
    %cst_77 = arith.constant 0.000000e+00 : f32
    %109 = vector.broadcast %cst_77 : f32 to vector<128x4xf32>
    %110 = arith.maximumf %108, %109 : vector<128x4xf32>
    %c0_78 = arith.constant 0 : index
    %c0_79 = arith.constant 0 : index
    %111 = vector.load %arg6[%c0_78, %c0_79] : memref<4x16xf32, #tpu.memory_space<vmem>>, vector<4x16xf32>
    %cst_80 = arith.constant dense<0.000000e+00> : vector<128x16xf32>
    %112 = tpu.matmul %110, %111, %cst_80 {dimension_numbers = #tpu.dot_dimension_numbers<[1], [0], [0], [1], [0, 0, 1, 1], [], []>} : vector<128x4xf32>, vector<4x16xf32>, vector<128x16xf32> -> vector<128x16xf32>
    %c0_81 = arith.constant 0 : index
    %c0_82 = arith.constant 0 : index
    %113 = vector.load %arg11[%c0_81, %c0_82] : memref<1x16xf32, #tpu.memory_space<vmem>>, vector<1x16xf32>
    %114 = vector.broadcast %113 : vector<1x16xf32> to vector<128x16xf32>
    %115 = arith.mulf %112, %114 : vector<128x16xf32>
    %c0_83 = arith.constant 0 : index
    %c0_84 = arith.constant 0 : index
    %116 = vector.load %arg12[%c0_83, %c0_84] : memref<1x16xf32, #tpu.memory_space<vmem>>, vector<1x16xf32>
    %117 = vector.broadcast %116 : vector<1x16xf32> to vector<128x16xf32>
    %118 = arith.addf %115, %117 : vector<128x16xf32>
    %119 = arith.addf %118, %13 : vector<128x16xf32>
    %cst_85 = arith.constant 0.000000e+00 : f32
    %120 = vector.broadcast %cst_85 : f32 to vector<128x16xf32>
    %121 = arith.maximumf %119, %120 : vector<128x16xf32>
    %122 = vector.shape_cast %121 : vector<128x16xf32> to vector<1x8x16x16xf32>
    %c0_86 = arith.constant 0 : index
    %c0_87 = arith.constant 0 : index
    %c0_88 = arith.constant 0 : index
    %c0_89 = arith.constant 0 : index
    %123 = vector.load %arg15[%c0_86, %c0_87, %c0_88, %c0_89] : memref<1x8x16x16xf32, #tpu.memory_space<vmem>>, vector<1x8x16x16xf32>
    tpu.vector_store %arg15[%c0_86, %c0_87, %c0_88, %c0_89], %122 {strides = array<i32>} : memref<1x8x16x16xf32, #tpu.memory_space<vmem>>, vector<1x8x16x16xf32>,
    return
  }
  func.func @transform_1(%arg0: i32, %arg1: i32) -> (i32, i32, i32, i32) {
    %c0_i32 = arith.constant 0 : i32
    %c0_i32_0 = arith.constant 0 : i32
    %c0_i32_1 = arith.constant 0 : i32
    return %arg0, %arg1, %c0_i32, %c0_i32_0 : i32, i32, i32, i32
  }
  func.func @transform_2(%arg0: i32, %arg1: i32) -> (i32, i32) {
    %c0_i32 = arith.constant 0 : i32
    %c0_i32_0 = arith.constant 0 : i32
    %c0_i32_1 = arith.constant 0 : i32
    return %c0_i32, %c0_i32_0 : i32, i32
  }
  func.func @transform_3(%arg0: i32, %arg1: i32) -> (i32, i32, i32) {
    %c0_i32 = arith.constant 0 : i32
    %c0_i32_0 = arith.constant 0 : i32
    %c0_i32_1 = arith.constant 0 : i32
    %c0_i32_2 = arith.constant 0 : i32
    return %c0_i32, %c0_i32_0, %c0_i32_1 : i32, i32, i32
  }
  func.func @transform_4(%arg0: i32, %arg1: i32) -> (i32, i32) {
    %c0_i32 = arith.constant 0 : i32
    %c0_i32_0 = arith.constant 0 : i32
    %c0_i32_1 = arith.constant 0 : i32
    return %c0_i32, %c0_i32_0 : i32, i32
  }
  func.func @transform_5(%arg0: i32, %arg1: i32) -> (i32, i32) {
    %c0_i32 = arith.constant 0 : i32
    %c0_i32_0 = arith.constant 0 : i32
    %c0_i32_1 = arith.constant 0 : i32
    return %c0_i32, %c0_i32_0 : i32, i32
  }
  func.func @transform_6(%arg0: i32, %arg1: i32) -> (i32, i32) {
    %c0_i32 = arith.constant 0 : i32
    %c0_i32_0 = arith.constant 0 : i32
    %c0_i32_1 = arith.constant 0 : i32
    return %c0_i32, %c0_i32_0 : i32, i32
  }
  func.func @transform_7(%arg0: i32, %arg1: i32) -> (i32, i32) {
    %c0_i32 = arith.constant 0 : i32
    %c0_i32_0 = arith.constant 0 : i32
    %c0_i32_1 = arith.constant 0 : i32
    return %c0_i32, %c0_i32_0 : i32, i32
  }
  func.func @transform_8(%arg0: i32, %arg1: i32) -> (i32, i32) {
    %c0_i32 = arith.constant 0 : i32
    %c0_i32_0 = arith.constant 0 : i32
    %c0_i32_1 = arith.constant 0 : i32
    return %c0_i32, %c0_i32_0 : i32, i32
  }
  func.func @transform_9(%arg0: i32, %arg1: i32) -> (i32, i32) {
    %c0_i32 = arith.constant 0 : i32
    %c0_i32_0 = arith.constant 0 : i32
    %c0_i32_1 = arith.constant 0 : i32
    return %c0_i32, %c0_i32_0 : i32, i32
  }
  func.func @transform_10(%arg0: i32, %arg1: i32) -> (i32, i32) {
    %c0_i32 = arith.constant 0 : i32
    %c0_i32_0 = arith.constant 0 : i32
    %c0_i32_1 = arith.constant 0 : i32
    return %c0_i32, %c0_i32_0 : i32, i32
  }
  func.func @transform_11(%arg0: i32, %arg1: i32) -> (i32, i32) {
    %c0_i32 = arith.constant 0 : i32
    %c0_i32_0 = arith.constant 0 : i32
    %c0_i32_1 = arith.constant 0 : i32
    return %c0_i32, %c0_i32_0 : i32, i32
  }
  func.func @transform_12(%arg0: i32, %arg1: i32) -> (i32, i32) {
    %c0_i32 = arith.constant 0 : i32
    %c0_i32_0 = arith.constant 0 : i32
    %c0_i32_1 = arith.constant 0 : i32
    return %c0_i32, %c0_i32_0 : i32, i32
  }
  func.func @transform_13(%arg0: i32, %arg1: i32) -> (i32, i32, i32, i32) {
    %c0_i32 = arith.constant 0 : i32
    %c0_i32_0 = arith.constant 0 : i32
    %c0_i32_1 = arith.constant 0 : i32
    return %arg0, %arg1, %c0_i32, %c0_i32_0 : i32, i32, i32, i32
  }
}

</mosaic_0001>

<bundles_post_ra>
// kernel: tpu_custom_call.1
= control target key start
LH: loop header
LB: loop body
LE: loop exit
PB: predicated region body
PF: predicated region fallthrough
CT: control target
= control target key end

     0   :  { %s6026_s0 = inlined_call_operand.hbm [shape: f32[2,16,16,16], index: 0, kind: input, shape index: {}]   ;;  %s6027_s1 = inlined_call_operand.hbm [shape: f32[2,16,16,16], index: 1, kind: input, shape index: {}]   ;;  %s6028_s2 = inlined_call_operand.vmem [shape: f32[16,4], index: 2, kind: input, shape index: {}]   ;;  %s6029_s3 = inlined_call_operand.vmem [shape: f32[9,4,4], index: 3, kind: input, shape index: {}]   ;;  %s6030_s4 = inlined_call_operand.vmem [shape: f32[4,16], index: 4, kind: input, shape index: {}]   ;;  %s6031_s5 = inlined_call_operand.vmem [shape: f32[1,4], index: 5, kind: input, shape index: {}]   ;;  %s6032_s6 = inlined_call_operand.vmem [shape: f32[1,4], index: 6, kind: input, shape index: {}]   ;;  %s6033_s7 = inlined_call_operand.vmem [shape: f32[1,4], index: 7, kind: input, shape index: {}]   ;;  %s6034_s8 = inlined_call_operand.vmem [shape: f32[1,4], index: 8, kind: input, shape index: {}]   ;;  %s6035_s9 = inlined_call_operand.vmem [shape: f32[1,16], index: 9, kind: input, shape index: {}]   ;;  %s6036_s10 = inlined_call_operand.vmem [shape: f32[1,16], index: 10, kind: input, shape index: {}]   ;;  %s6037_s11 = inlined_call_operand.vmem [shape: f32[160,1], index: 11, kind: input, shape index: {}]   ;;  %s6038_s12 = inlined_call_operand.vmem [shape: f32[160,1], index: 12, kind: input, shape index: {}]   ;;  %s6039_s13 = inlined_call_operand.hbm [shape: f32[2,16,16,16], index: 13, kind: output, shape index: {}]  }
   0x1   :  { %6078 = sst [smem:[#allocation43_spill]] %s6027_s1 }
   0x2   :  { %6079 = sst [smem:[#allocation44_spill]] %s6029_s3 }
   0x3   :  { %6080 = sst [smem:[#allocation45_spill]] %s6030_s4 }
   0x4   :  { %6081 = sst [smem:[#allocation46_spill]] %s6033_s7 }
   0x5   :  { %6082 = sst [smem:[#allocation47_spill]] %s6034_s8 }
   0x6   :  { %6083 = sst [smem:[#allocation48_spill]] %s6035_s9 }
   0x7   :  { %6084 = sst [smem:[#allocation49_spill]] %s6036_s10 }
   0x8   :  { %6085 = sst [smem:[#allocation50_spill]] %s6038_s12 }
   0x9   :  { %6086 = sst [smem:[#allocation51_spill]] %s6039_s13 }
   0xa   :  { %18 = vsyncpa [#allocation6], 0 }
   0xb   :  { %20 = vsyncpa [#allocation6 + $0x1], 0 }
   0xc   :  { %21 = vsyncpa [#allocation7], 0 }
   0xd   :  { %23 = vsyncpa [#allocation7 + $0x1], 0  ;;  %s4704_s25 = smov 0   ;;  %s4706_s26 = smov 0  }
   0xe   :  { %s4708_s27 = smov 0   ;;  %s4710_s28 = smov 0  }
   0xf   :  { %s4712_s29 = smov 0   ;;  %s4714_s30 = smov 0  }
  0x10   :  { %s4716_s14 = smov 0   ;;  %s4718_s15 = smov 0  }
  0x11 LB: > { %6087 = sst [smem:[#allocation19_spill]] %s4595_s25  ;;  %s3461_s16 = sadd.s32 4294967295, %s4623_s15   ;;  %s4623_s15 = sphi %s4718_s15, %s29_s15   ;;  %s4619_s14 = sphi %s4716_s14, %s6160_s14   ;;  %s4615_s30 = sphi %s4714_s30, %s6165_s30   ;;  %s4611_s29 = sphi %s4712_s29, %s6158_s29   ;;  %s4607_s28 = sphi %s4710_s28, %s6164_s28   ;;  %s4603_s27 = sphi %s4708_s27, %s6163_s27   ;;  %s4599_s26 = sphi %s4706_s26, %s6162_s26   ;;  %s4595_s25 = sphi %s4704_s25, %s6161_s25  }
  0x12   : > { %6088 = sst [smem:[#allocation20_spill]] %s4619_s14  ;;  %s3462_s17 = sadd.s32 4294967294, %s4623_s15  }
  0x13   : > { %s38_s18 = sadd.s32 1, %s4615_s30  ;;  %s41_s19 = sadd.s32 1, %s4619_s14 }
  0x14   : > { %p39_p0 = scmp.ge.s32.totalorder %s38_s18, 2  ;;  %s50_s20 = sadd.s32 1, %s4603_s27 }
  0x15   : > { %p57_p1 = scmp.ne.s32.totalorder %s4603_s27, %s4599_s26  ;;  %p58_p2 = scmp.eq.s32.totalorder %s4623_s15, 0 }
  0x16   : > { %s6167_s18 = smov (%p39_p0, %s38_s18), 0  ;;  %s6169_s19 = smov (!%p39_p0, %s41_s19), %s4619_s14 }
  0x17   : > { %6089 = sst [smem:[#allocation21_spill]] %s6167_s18  ;;  %s46_s21 = ssub.s32 %s4615_s30, %s6167_s18 }
  0x18   : > { %p4757_p3 = por %p58_p2, %p57_p1  ;;  %p43_p4 = scmp.ge.s32.totalorder %s6169_s19, 2 }
  0x19   : > { %p63_p5 = scmp.ne.s32.totalorder %s4599_s26, %s4595_s25  ;;  %p64_p6 = scmp.eq.s32.totalorder %s3461_s16, 0 }
  0x1a   : > { %p320_p7 = scmp.eq.s32.totalorder %s3461_s16, 3  ;;  %s6171_s19 = smov (%p43_p4, %s6169_s19), 0 }
  0x1b   : > { %6091 = sst [smem:[#allocation22_spill]] %s6171_s19  ;;  %p4765_p8 = por %p64_p6, %p63_p5 }
  0x1c   : > { %p4769_p9 = por %p320_p7, %p57_p1  ;;  %s45_s18 = ssub.s32 %s4619_s14, %s6171_s19 }
  0x1d   : > { %p326_p10 = scmp.eq.s32.totalorder %s3462_s17, 3  ;;  %s47_s13 = sor.u32 %s46_s21, %s45_s18 }
  0x1e   : > { %s6093_s24 = scalar_select %p4769_p9, 1, 0 }
  0x1f   : > { %p48_p11 = scmp.eq.s32.totalorder %s47_s13, 0  ;;  %p4775_p12 = por %p326_p10, %p63_p5 }
  0x20   : > { %p4352_p13 = scmp.lt.s32.totalorder %s4623_s15, 4  ;;  %s379_s16 = sand.u32 1, %s4603_s27  }
  0x21   : > { %s6094_s25 = scalar_select %p4775_p12, 1, 0 }
  0x22   : > { %s4782_s10 = scalar_select %p48_p11, %s4603_s27, %s50_s20  }
  0x23   : > { %s3465_s9 = sshll.u32 %s379_s16, 7  ;;  %s3700_s8 = sshll.u32 %s4615_s30, 4 }
  0x24   : > { %s3468_s7 = sshll.u32 %s4619_s14, 5  ;;  %s383_s4 = scalar_lea.vmem [#allocation5], %s3465_s9 }
  0x25   : > { %s393_s3 = sshll.u32 %s383_s4, 4  ;;  %s390_s12 = sadd.s32 %s3700_s8, %s3468_s7  ;;  %s4786_s3 = int_to_ptr.vmem [resolvable:$true] %s393_s3 }
  0x26   : > { %s3469_s19 = sshll.u32 %s390_s12, 7  ;;  %p4790_p0 = pnand %p4352_p13, %p4757_p3 }
  0x27   : > { %s6096_s1 = sld [smem:[#allocation43_spill]]  ;;  %s4799_s4 = scalar_lea.sflag [#allocation6], %s379_s16 }
  0x28   : > { %p4433_p2 = pneg %p4790_p0 }
  0x2d   : > { %s4797_s20 = scalar_lea.hbm %s6096_s1, %s3469_s19  ;;  %s4436_s12 = scalar_lea.hbm %s6096_s1, 8192 }
  0x2e   : > { %s4431_s7 = scalar_lea.hbm %s4797_s20, 2048  ;;  %p4437_p5 = scmp.lt.u32.totalorder %s4797_s20, %s6096_s1 }
  0x2f   : > { %p4432_p1 = scmp.ne.s32.totalorder %s4797_s20, %s4431_s7  ;;  %p4438_p6 = scmp.lt.u32.totalorder %s4436_s12, %s4431_s7 }
  0x30   : > { %p4440_p10 = scmp.lt.u32.totalorder %s4431_s7, %s4797_s20 }
  0x31   : > { %p4434_p3 = pnand %p4433_p2, %p4432_p1  ;;  %p4439_p7 = por %p4438_p6, %p4437_p5 }
  0x33   : > { %p4435_p4 = pneg %p4434_p3  ;;  %p4441_p11 = por %p4440_p10, %p4439_p7 }
  0x35   : > { %p4442_p13 = pnand %p4441_p11, %p4435_p4 }
  0x37   : > { %4445 = shalt.err (!%p4442_p13)
}
  0x38   : > { %s4446_s22 = scalar_lea.vmem %s4786_s3, 2048  ;;  %s4625_s16 = smov [#allocation5]  }
  0x39   : > { %p4447_p1 = scmp.ne.s32.totalorder %s4786_s3, %s4446_s22  ;;  %s4451_s17 = sshll.u32 %s4625_s16, 4  ;;  %s4452_s17 = int_to_ptr.vmem [resolvable:$false] %s4451_s17 }
  0x3a   : > { %s4453_s18 = scalar_lea.vmem %s4452_s17, 4096  ;;  %p4454_p9 = scmp.lt.s32.totalorder %s4786_s3, %s4452_s17 }
  0x3b   : > { %p4449_p3 = pnand %p4447_p1, %p4433_p2  ;;  %p4455_p5 = scmp.lt.s32.totalorder %s4453_s18, %s4446_s22 }
  0x3d   : > { %p4450_p12 = pneg %p4449_p3  ;;  %p4456_p6 = por %p4455_p5, %p4454_p9 }
  0x3f   : > { %p4457_p7 = pnand %p4456_p6, %p4450_p12 }
  0x41   : > { %4460 = shalt.err (!%p4457_p7)
}
  0x42   : > { %s4626_s7 = smov 128   ;;  %s4627_s8 = smov 8  }
  0x43   : > { %4347 = dma.hbm_to_vmem [thread:$0]  (!%p4790_p0), %s4797_s20, 2048, %s4786_s3, %s4799_s4, %s4626_s7, %s4626_s7, %s4627_s8  }
  0x44   : > { %p3470_p2 = scmp.ge.s32.totalorder %s4623_s15, 1  ;;  %p401_p4 = scmp.lt.s32.totalorder %s4623_s15, 5 }
  0x46   : > { %p402_p10 = pnand %p3470_p2, %p401_p4 }
  0x48   : > { %405 = sbr.rel (%p402_p10) target bundleno = 1161 (0x489), region = 68 }
  0x4f   : > { %s4830_s9 = sand.u32 1, %s4599_s26  }
  0x50   : > { %s6047_s12 = sshll.u32 %s4830_s9, 7  ;;  %s408_s19 = scalar_lea.sflag [#allocation6], %s4830_s9 }
  0x51   : > { %s4836_s21 = scalar_lea.vmem [#allocation5], %s6047_s12 }
  0x52   : > { %4578 = dma.done.wait (%p4765_p8), %s408_s19, 2048  }
  0x53   : > { %4580 = vsyncadd (%p4765_p8), %s408_s19, 4294965248  ;;  %vm521_vm0 = vcmask 130048   ;;  %v519_v0 = vld [vmem:[%s6028_s2] sm:$0xff]  ;;  %v520_v1 = vld [vmem:[%s6028_s2 + $0x8] sm:$0xff]  ;;  %s3473_s23 = sshll.u32 %s4607_s28, 3  ;;  %s3477_s18 = sshll.u32 %s4611_s29, 8 }
  0x54   : > { %v4849_v2 = vld [vmem:[%s4836_s21] sm:$0xff]  ;;  %v4194_v3 = vpack.c.bf16 %v520_v1, %v519_v0  ;;  %v4854_v4 = vld [vmem:[%s4836_s21 + $0x8] sm:$0xff]  ;;  %v4857_v5 = vld [vmem:[%s4836_s21 + $0x10] sm:$0xff]  ;;  %s3474_s22 = sadd.s32 4294967295, %s3473_s23  ;;  %s460_s16 = sadd.s32 8, %s3473_s23 }
  0x55   : > { %6097 = vst [vmem:[#allocation23_spill] sm:$0xff] %v4849_v2  ;;  %3900 = vmatprep.mubr.msk.f32.mxu0 %vm521_vm0, %v4849_v2  ;;  %6098 = vst [vmem:[#allocation24_spill] sm:$0xff] %v4854_v4  ;;  %v4864_v6 = vld [vmem:[%s4836_s21 + $0x18] sm:$0xff]  ;;  %v4867_v7 = vld [vmem:[%s4836_s21 + $0x20] sm:$0xff]  ;;  %p458_p8 = scmp.gt.s32.totalorder %s3474_s22, 0  ;;  %p461_p9 = scmp.lt.s32.totalorder %s460_s16, 15 }
  0x56   : > { %4195 = vmatprep.subr.bf16.mxu0 %v4194_v3  ;;  %6099 = vst [vmem:[#allocation25_spill] sm:$0xff] %v4857_v5  ;;  %6100 = vst [vmem:[#allocation26_spill] sm:$0xff] %v4864_v6  ;;  %v4874_v8 = vld [vmem:[%s4836_s21 + $0x28] sm:$0xff]  ;;  %v4877_v9 = vld [vmem:[%s4836_s21 + $0x30] sm:$0xff]  ;;  %p6049_p12 = scmp.gt.s32.totalorder %s4607_s28, 0  ;;  %s4628_s13 = smov [#allocation2]  }
  0x57   : > { %4197 = vmatpush3.bf16.msra.mxu0 %v4194_v3  ;;  %6101 = vst [vmem:[#allocation27_spill] sm:$0xff] %v4867_v7  ;;  %6102 = vst [vmem:[#allocation28_spill] sm:$0xff] %v4874_v8  ;;  %v4884_v10 = vld [vmem:[%s4836_s21 + $0x38] sm:$0xff]  ;;  %v4887_v11 = vld [vmem:[%s4836_s21 + $0x40] sm:$0xff]  ;;  %s6173_s22 = smov (!%p458_p8, %s3474_s22), 0  ;;  %s6175_s16 = smov (!%p461_p9, %s460_s16), 15 }
  0x58   : > { %6103 = vst [vmem:[#allocation29_spill] sm:$0xff] %v4877_v9  ;;  %6104 = vst [vmem:[#allocation30_spill] sm:$0xff] %v4884_v10  ;;  %v4894_v12 = vld [vmem:[%s4836_s21 + $0x48] sm:$0xff]  ;;  %v4897_v13 = vld [vmem:[%s4836_s21 + $0x50] sm:$0xff]  ;;  %s3476_s17 = sshll.u32 %s6173_s22, 4  ;;  %s478_s20 = sshll.u32 %s4628_s13, 4  ;;  %s4934_s20 = int_to_ptr.vmem [resolvable:$true] %s478_s20 }
  0x59   : > { %6105 = vst [vmem:[#allocation31_spill] sm:$0xff] %v4887_v11  ;;  %6106 = vst [vmem:[#allocation32_spill] sm:$0xff] %v4894_v12  ;;  %v4904_v14 = vld [vmem:[%s4836_s21 + $0x58] sm:$0xff]  ;;  %v4907_v15 = vld [vmem:[%s4836_s21 + $0x60] sm:$0xff]  ;;  %s468_s7 = sadd.s32 %s3477_s18, %s3476_s17  ;;  %s3480_s4 = sshll.u32 %s6175_s16, 4 }
  0x5a   : > { %3901 = vmatmul.mubr.msk.f32.vlgmr.msra.gmra.mrb[0].mxu0 %vm521_vm0, %v4854_v4  ;;  %6107 = vst [vmem:[#allocation33_spill] sm:$0xff] %v4897_v13  ;;  %6108 = vst [vmem:[#allocation34_spill] sm:$0xff] %v4904_v14  ;;  %v4914_v16 = vld [vmem:[%s4836_s21 + $0x68] sm:$0xff]  ;;  %v4917_v17 = vld [vmem:[%s4836_s21 + $0x70] sm:$0xff]  ;;  %s3478_s8 = sshll.u32 %s468_s7, 4  ;;  %s487_s12 = sadd.s32 %s3480_s4, %s3477_s18 }
  0x5b   : > { %3903 = vmatprep.mubr.msk.f32.mxu0 %vm521_vm0, %v4857_v5  ;;  %6109 = vst [vmem:[#allocation35_spill] sm:$0xff] %v4907_v15  ;;  %6110 = vst [vmem:[#allocation36_spill] sm:$0xff] %v4914_v16  ;;  %v4924_v18 = vld [vmem:[%s4836_s21 + $0x78] sm:$0xff]  ;;  %s470_s21 = scalar_lea.hbm %s6026_s0, %s3478_s8  ;;  %s4465_s17 = scalar_lea.hbm %s6026_s0, 8192 }
  0x5c   : > { %6111 = vst [vmem:[#allocation37_spill] sm:$0xff] %v4917_v17  ;;  %6112 = vst [vmem:[#allocation38_spill] sm:$0xff] %v4924_v18  ;;  %s4461_s23 = scalar_lea.hbm %s470_s21, 256  ;;  %p4466_p1 = scmp.lt.u32.totalorder %s470_s21, %s6026_s0 }
  0x5d   : > { %p4462_p0 = scmp.ne.s32.totalorder %s470_s21, %s4461_s23  ;;  %p4467_p3 = scmp.lt.u32.totalorder %s4465_s17, %s4461_s23 }
  0x5e   : > { %3904 = vmatmul.mubr.msk.f32.gmra.mrb[2].mxu0 %vm521_vm0, %v4864_v6  ;;  %p4469_p6 = scmp.lt.u32.totalorder %s4461_s23, %s470_s21 }
  0x5f   : > { %3906 = vmatprep.mubr.msk.f32.mxu0 %vm521_vm0, %v4867_v7  ;;  %p4463_p11 = pnand %p4462_p0, %p6049_p12  ;;  %p4468_p5 = por %p4467_p3, %p4466_p1 }
  0x61   : > { %p4464_p13 = pneg %p4463_p11  ;;  %p4470_p7 = por %p4469_p6, %p4468_p5 }
  0x62   : > { %3907 = vmatmul.mubr.msk.f32.gmra.mrb[4].mxu0 %vm521_vm0, %v4874_v8 }
  0x63   : > { %3909 = vmatprep.mubr.msk.f32.mxu0 %vm521_vm0, %v4877_v9  ;;  %p4471_p2 = pnand %p4470_p7, %p4464_p13 }
  0x66   : > { %3910 = vmatmul.mubr.msk.f32.gmra.mrb[6].mxu0 %vm521_vm0, %v4884_v10 }
  0x67   : > { %3912 = vmatprep.mubr.msk.f32.mxu0 %vm521_vm0, %v4887_v11 }
  0x6a   : > { %3913 = vmatmul.mubr.msk.f32.gmra.mrb[8].mxu0 %vm521_vm0, %v4894_v12 }
  0x6b   : > { %3915 = vmatprep.mubr.msk.f32.mxu0 %vm521_vm0, %v4897_v13 }
  0x6e   : > { %3916 = vmatmul.mubr.msk.f32.gmra.mrb[10].mxu0 %vm521_vm0, %v4904_v14 }
  0x6f   : > { %3918 = vmatprep.mubr.msk.f32.mxu0 %vm521_vm0, %v4907_v15 }
  0x72   : > { %3919 = vmatmul.mubr.msk.f32.gmra.mrb[12].mxu0 %vm521_vm0, %v4914_v16 }
  0x73   : > { %3921 = vmatprep.mubr.msk.f32.mxu0 %vm521_vm0, %v4917_v17 }
  0x76   : > { %3922 = vmatmul.mubr.msk.f32.gmra.mrb[14].mxu0 %vm521_vm0, %v4924_v18 }
  0x77   : > { %4474 = shalt.err (!%p4471_p2)  }
  0x78   : > { %s4475_s1 = scalar_lea.vmem %s4934_s20, 256  ;;  %s4481_s14 = scalar_lea.vmem %s4934_s20, 512 }
  0x79   : > { %p4476_p4 = scmp.ne.s32.totalorder %s4934_s20, %s4475_s1  ;;  %p4482_p9 = scmp.lt.s32.totalorder %s4934_s20, %s4934_s20 }
  0x7a   : > { %p4483_p0 = scmp.lt.s32.totalorder %s4481_s14, %s4475_s1 }
  0x7b   : > { %p4477_p10 = pnand %p4476_p4, %p6049_p12 }
  0x7c   : > { %p4484_p11 = por %p4483_p0, %p4482_p9 }
  0x7d   : > { %p4478_p8 = pneg %p4477_p10 }
  0x7f   : > { %p4485_p1 = pnand %p4484_p11, %p4478_p8 }
  0x81   : > { %4488 = shalt.err (!%p4485_p1)  }
  0x82   : > { %4335 = dma.hbm_to_vmem [thread:$0]  (%p6049_p12), %s470_s21, 256, %s4934_s20, [#allocation4] }
  0x83   : > { %p455_p13 = scmp.lt.s32.totalorder %s4607_s28, 1  ;;  %s3482_s16 = sshll.u32 %s487_s12, 4 }
  0x84   : > { %s489_s13 = scalar_lea.hbm %s6026_s0, %s3482_s16  ;;  %s4629_s4 = smov [#allocation2 + $0x10]  }
  0x85   : > { %s499_s23 = sshll.u32 %s4629_s4, 4  ;;  %s4489_s22 = scalar_lea.hbm %s489_s13, 256  ;;  %s500_s23 = int_to_ptr.vmem [resolvable:$true] %s499_s23 }
  0x86   : > { %p4490_p3 = scmp.ne.s32.totalorder %s489_s13, %s4489_s22  ;;  %p4494_p7 = scmp.lt.u32.totalorder %s489_s13, %s6026_s0 }
  0x87   : > { %p4495_p2 = scmp.lt.u32.totalorder %s4465_s17, %s4489_s22  ;;  %p4497_p10 = scmp.lt.u32.totalorder %s4489_s22, %s489_s13 }
  0x88   : > { %p4491_p5 = pnand %p4490_p3, %p455_p13 }
  0x89   : > { %p4496_p4 = por %p4495_p2, %p4494_p7 }
  0x8a   : > { %p4492_p6 = pneg %p4491_p5 }
  0x8b   : > { %p4498_p8 = por %p4497_p10, %p4496_p4 }
  0x8d   : > { %p4499_p9 = pnand %p4498_p8, %p4492_p6 }
  0x8f   : > { %4502 = shalt.err (!%p4499_p9)  }
  0x90   : > { %s4503_s12 = scalar_lea.vmem %s500_s23, 256  ;;  %p4510_p3 = scmp.lt.s32.totalorder %s500_s23, %s4934_s20 }
  0x91   : > { %p4504_p0 = scmp.ne.s32.totalorder %s500_s23, %s4503_s12  ;;  %p4511_p5 = scmp.lt.s32.totalorder %s4481_s14, %s4503_s12 }
  0x93   : > { %p4505_p11 = pnand %p4504_p0, %p455_p13  ;;  %p4512_p12 = por %p4511_p5, %p4510_p3 }
  0x95   : > { %p4506_p1 = pneg %p4505_p11 }
  0x97   : > { %p4513_p2 = pnand %p4512_p12, %p4506_p1 }
  0x99   : > { %4516 = shalt.err (!%p4513_p2)  }
  0x9a   : > { %4337 = dma.hbm_to_vmem [thread:$0]  (%p455_p13), %s489_s13, 256, %s500_s23, [#allocation4 + $0x1]  ;;  %v4983_v19 = vld [vmem:[%s6031_s5] ss:$0 sm:$0xff]  ;;  %vm777_vm1 = vcmask 31744  }
  0x9b   : > { %v4988_v21 = vld [vmem:[%s6032_s6] ss:$0 sm:$0xff]  ;;  %s6113_s20 = sshll.u32 %s4830_s9, 7  ;;  %p6114_p12 = scmp.gt.s32.totalorder %s4607_s28, 0 }
  0x9c   : > { %s5040_s14 = scalar_lea.vmem [#allocation8], %s6113_s20 }
 0x12d   : > { %v3902_v20 = vpop.f32.mrb[0].mxu0 }
 0x12e   : > { %v723_v22 = vmul.f32 %v3902_v20, %v4983_v19  ;;  %v636_v23 = vpop.f32.mrb[1].mxu0 }
 0x12f   : > { %v722_v24 = vmul.f32 %v4983_v19, %v636_v23 }
 0x130   : > { %v746_v25 = vadd.f32 %v4988_v21, %v723_v22 }
 0x131   : > { %v745_v26 = vadd.f32 %v4988_v21, %v722_v24  ;;  %v3905_v27 = vpop.f32.mrb[2].mxu0 }
 0x132   : > { %v762_v28 = vmax.f32 %v746_v25, 0.0  ;;  %v725_v29 = vmul.f32 %v3905_v27, %v4983_v19  ;;  %v646_v30 = vpop.f32.mrb[3].mxu0 }
 0x133   : > { %v761_v31 = vmax.f32 %v745_v26, 0.0  ;;  %v724_v32 = vmul.f32 %v4983_v19, %v646_v30 }
 0x134   : > { %779 = vst.msk [vmem:[#allocation3 + $0x18] sm:$0xff] %vm777_vm1, %v762_v28  ;;  %v748_v33 = vadd.f32 %v4988_v21, %v725_v29 }
 0x135   : > { %778 = vst.msk [vmem:[#allocation3 + $0x10] sm:$0xff] %vm777_vm1, %v761_v31  ;;  %v747_v34 = vadd.f32 %v4988_v21, %v724_v32  ;;  %v3908_v35 = vpop.f32.mrb[4].mxu0 }
 0x136   : > { %v764_v36 = vmax.f32 %v748_v33, 0.0  ;;  %v727_v37 = vmul.f32 %v3908_v35, %v4983_v19  ;;  %v656_v38 = vpop.f32.mrb[5].mxu0 }
 0x137   : > { %v763_v39 = vmax.f32 %v747_v34, 0.0  ;;  %v726_v40 = vmul.f32 %v4983_v19, %v656_v38 }
 0x138   : > { %781 = vst.msk [vmem:[#allocation3 + $0x28] sm:$0xff] %vm777_vm1, %v764_v36  ;;  %v750_v41 = vadd.f32 %v4988_v21, %v727_v37 }
 0x139   : > { %780 = vst.msk [vmem:[#allocation3 + $0x20] sm:$0xff] %vm777_vm1, %v763_v39  ;;  %v749_v42 = vadd.f32 %v4988_v21, %v726_v40  ;;  %v3911_v43 = vpop.f32.mrb[6].mxu0 }
 0x13a   : > { %v766_v44 = vmax.f32 %v750_v41, 0.0  ;;  %v729_v45 = vmul.f32 %v3911_v43, %v4983_v19  ;;  %v666_v46 = vpop.f32.mrb[7].mxu0 }
 0x13b   : > { %v765_v47 = vmax.f32 %v749_v42, 0.0  ;;  %v728_v48 = vmul.f32 %v4983_v19, %v666_v46 }
 0x13c   : > { %783 = vst.msk [vmem:[#allocation3 + $0x38] sm:$0xff] %vm777_vm1, %v766_v44  ;;  %v752_v49 = vadd.f32 %v4988_v21, %v729_v45 }
 0x13d   : > { %782 = vst.msk [vmem:[#allocation3 + $0x30] sm:$0xff] %vm777_vm1, %v765_v47  ;;  %v751_v50 = vadd.f32 %v4988_v21, %v728_v48  ;;  %v3914_v51 = vpop.f32.mrb[8].mxu0 }
 0x13e   : > { %v768_v52 = vmax.f32 %v752_v49, 0.0  ;;  %v731_v53 = vmul.f32 %v3914_v51, %v4983_v19  ;;  %v676_v54 = vpop.f32.mrb[9].mxu0 }
 0x13f   : > { %v767_v55 = vmax.f32 %v751_v50, 0.0  ;;  %v730_v56 = vmul.f32 %v4983_v19, %v676_v54 }
 0x140   : > { %785 = vst.msk [vmem:[#allocation3 + $0x48] sm:$0xff] %vm777_vm1, %v768_v52  ;;  %v754_v57 = vadd.f32 %v4988_v21, %v731_v53 }
 0x141   : > { %784 = vst.msk [vmem:[#allocation3 + $0x40] sm:$0xff] %vm777_vm1, %v767_v55  ;;  %v753_v58 = vadd.f32 %v4988_v21, %v730_v56  ;;  %v3917_v59 = vpop.f32.mrb[10].mxu0 }
 0x142   : > { %v770_v60 = vmax.f32 %v754_v57, 0.0  ;;  %v733_v61 = vmul.f32 %v3917_v59, %v4983_v19  ;;  %v686_v62 = vpop.f32.mrb[11].mxu0 }
 0x143   : > { %v769_v63 = vmax.f32 %v753_v58, 0.0  ;;  %v732_v0 = vmul.f32 %v4983_v19, %v686_v62 }
 0x144   : > { %787 = vst.msk [vmem:[#allocation3 + $0x58] sm:$0xff] %vm777_vm1, %v770_v60  ;;  %v756_v1 = vadd.f32 %v4988_v21, %v733_v61 }
 0x145   : > { %786 = vst.msk [vmem:[#allocation3 + $0x50] sm:$0xff] %vm777_vm1, %v769_v63  ;;  %v755_v3 = vadd.f32 %v4988_v21, %v732_v0  ;;  %v3920_v20 = vpop.f32.mrb[12].mxu0 }
 0x146   : > { %v772_v22 = vmax.f32 %v756_v1, 0.0  ;;  %v735_v23 = vmul.f32 %v3920_v20, %v4983_v19  ;;  %v696_v24 = vpop.f32.mrb[13].mxu0 }
 0x147   : > { %v771_v25 = vmax.f32 %v755_v3, 0.0  ;;  %v734_v26 = vmul.f32 %v4983_v19, %v696_v24 }
 0x148   : > { %789 = vst.msk [vmem:[#allocation3 + $0x68] sm:$0xff] %vm777_vm1, %v772_v22  ;;  %v758_v27 = vadd.f32 %v4988_v21, %v735_v23 }
 0x149   : > { %788 = vst.msk [vmem:[#allocation3 + $0x60] sm:$0xff] %vm777_vm1, %v771_v25  ;;  %v757_v28 = vadd.f32 %v4988_v21, %v734_v26  ;;  %v3923_v29 = vpop.f32.mrb[14].mxu0 }
 0x14a   : > { %v774_v30 = vmax.f32 %v758_v27, 0.0  ;;  %v737_v31 = vmul.f32 %v3923_v29, %v4983_v19  ;;  %v706_v32 = vpop.f32.mrb[15].mxu0 }
 0x14b   : > { %v773_v33 = vmax.f32 %v757_v28, 0.0  ;;  %v736_v34 = vmul.f32 %v4983_v19, %v706_v32 }
 0x14c   : > { %791 = vst.msk [vmem:[#allocation3 + $0x78] sm:$0xff] %vm777_vm1, %v774_v30  ;;  %v760_v35 = vadd.f32 %v4988_v21, %v737_v31 }
 0x14d   : > { %790 = vst.msk [vmem:[#allocation3 + $0x70] sm:$0xff] %vm777_vm1, %v773_v33  ;;  %v759_v36 = vadd.f32 %v4988_v21, %v736_v34 }
 0x14e   : > { %v776_v37 = vmax.f32 %v760_v35, 0.0 }
 0x14f   : > { %v775_v38 = vmax.f32 %v759_v36, 0.0 }
 0x150   : > { %793 = vst.msk [vmem:[#allocation3 + $0x88] sm:$0xff] %vm777_vm1, %v776_v37 }
 0x151   : > { %792 = vst.msk [vmem:[#allocation3 + $0x80] sm:$0xff] %vm777_vm1, %v775_v38 }
 0x152   : > { %4582 = dma.done.wait (%p6114_p12), [#allocation4], 256  ;;  %p6115_p6 = pmov %p6114_p12 }
 0x154   : > { %4584 = vsyncadd (%p6115_p6), [#allocation4], 4294967040 }
 0x155   : > { %4586 = dma.done.wait (%p455_p13), [#allocation4 + $0x1], 256 }
 0x156   : > { %4588 = vsyncadd (%p455_p13), [#allocation4 + $0x1], 4294967040  ;;  %v4630_v19 = vmov 0   ;;  %v1029_v21 = vld [vmem:[%s6037_s11 + $0x70] sm:$0xff]  ;;  %v1027_v39 = vld [vmem:[%s6037_s11 + $0x60] sm:$0xff]  ;;  %s6116_s23 = sld [smem:[#allocation50_spill]]  ;;  %p6121_p7 = pmov %p6115_p6 }
 0x157   : > { %4430 = vset.pattern.permute.xlu1 %v4630_v19  ;;  %4429 = vset.pattern.permute.xlu0 %v4630_v19  ;;  %v813_v40 = vld [vmem:[%s6028_s2] sm:$0xff]  ;;  %v814_v41 = vld [vmem:[%s6028_s2 + $0x8] sm:$0xff]  ;;  %v1030_v43 = vld [vmem:[%s6037_s11 + $0x78] sm:$0xff]  ;;  %vm1387_vm2 = vcmask 1043456   ;;  %s6117_s16 = sld [smem:[#allocation44_spill]]  ;;  %s6133_s7 = sld [smem:[#allocation45_spill]] }
 0x158   : > { %1107 = vperm.xlu1 %4430, %v1029_v21   ;;  %1097 = vperm.xlu0 %4429, %v1027_v39   ;;  %v4198_v42 = vpack.c.bf16 %v814_v41, %v813_v40  ;;  %v809_v44 = vld [vmem:[#allocation2] sm:$0xff]  ;;  %v1028_v45 = vld [vmem:[%s6037_s11 + $0x68] sm:$0xff]  ;;  %v811_v48 = vld [vmem:[#allocation2 + $0x10] sm:$0xff]  ;;  %v992_v41 = vlaneseq  ;;  %s938_s8 = scalar_select %p6121_p7, 1, 0 }
 0x159   : > { %3928 = vmatprep.mubr.msk.f32.mxu1 %vm521_vm0, %v809_v44  ;;  %v810_v46 = vld [vmem:[#allocation2 + $0x8] sm:$0xff]  ;;  %v1031_v49 = vld [vmem:[%s6037_s11 + $0x80] sm:$0xff]  ;;  %v812_v50 = vld [vmem:[#allocation2 + $0x18] sm:$0xff]  ;;  %s945_s1 = scalar_select %p455_p13, 1, 0 }
 0x15a   : > { %4199 = vmatprep.subr.bf16.mxu1 %v4198_v42  ;;  %v1032_v47 = vld [vmem:[%s6037_s11 + $0x88] sm:$0xff]  ;;  %v1019_v23 = vld [vmem:[%s6037_s11 + $0x20] sm:$0xff]  ;;  %v1021_v27 = vld [vmem:[%s6037_s11 + $0x30] sm:$0xff]  ;;  %s6134_s21 = sld [smem:[#allocation46_spill]]  ;;  %s6136_s3 = sld [smem:[#allocation48_spill]] }
 0x15b   : > { %4201 = vmatpush3.bf16.msra.mxu1 %v4198_v42  ;;  %v1015_v24 = vld [vmem:[%s6037_s11] sm:$0xff]  ;;  %v1020_v25 = vld [vmem:[%s6037_s11 + $0x28] sm:$0xff]  ;;  %v1017_v28 = vld [vmem:[%s6037_s11 + $0x10] sm:$0xff]  ;;  %v5208_v42 = vshrl.u32 %v992_v41, 7  ;;  %v946_v12 = vstv %s945_s1  ;;  %s6135_s1 = sld [smem:[#allocation47_spill]]  ;;  %s6137_s22 = sld [smem:[#allocation49_spill]] }
 0x15c   : > { %1112 = vperm.xlu1 %4430, %v1030_v43   ;;  %1102 = vperm.xlu0 %4429, %v1028_v45   ;;  %v1199_v51 = vld [vmem:[%s6116_s23 + $0x18] sm:$0xff]  ;;  %v1198_v52 = vld [vmem:[%s6116_s23 + $0x10] sm:$0xff]  ;;  %v1201_v53 = vld [vmem:[%s6116_s23 + $0x28] sm:$0xff]  ;;  %vm947_vm6 = vcmp.eq.s32.totalorder %v946_v12, 1  ;;  %s6154_s17 = sld [smem:[#allocation51_spill]]  ;;  %s3332_s18 = scalar_lea.sflag [#allocation7], %s4830_s9 }
 0x15d   : > { %v1200_v54 = vld [vmem:[%s6116_s23 + $0x20] sm:$0xff]  ;;  %v5093_v55 = vld [vmem:[%s6117_s16 + $0xc] sm:$0xf]  ;;  %v1203_v56 = vld [vmem:[%s6116_s23 + $0x38] sm:$0xff]  ;;  %vm994_vm3 = vcmp.lt.s32.totalorder %v5208_v42, 1  ;;  %vm1175_vm4 = vcmp.lt.s32.totalorder %v5208_v42, 7 }
 0x15e   : > { %3929 = vmatmul.mubr.msk.f32.vlgmr.msra.gmra.mrb[0].mxu1 %vm521_vm0, %v810_v46  ;;  %4202 = vmatprep.subr.msk.mxu1 %vm1387_vm2, %v5093_v55  ;;  %v1202_v57 = vld [vmem:[%s6116_s23 + $0x30] sm:$0xff]  ;;  %v1205_v59 = vld [vmem:[%s6116_s23 + $0x48] sm:$0xff]  ;;  %v1204_v60 = vld [vmem:[%s6116_s23 + $0x40] sm:$0xff]  ;;  %p6155_p4 = scmp.ne.s32.totalorder %s6093_s24, 0 }
 0x15f   : > { %3931 = vmatprep.mubr.msk.f32.mxu1 %vm521_vm0, %v811_v48  ;;  %4203 = vmatpush3.msk.msra.mxu1 %vm1387_vm2, %v5093_v55  ;;  %v5108_v58 = vld [vmem:[%s6117_s16 + $0x10] sm:$0xf]  ;;  %v1207_v61 = vld [vmem:[%s6116_s23 + $0x58] sm:$0xff]  ;;  %v1209_v63 = vld [vmem:[%s6116_s23 + $0x68] sm:$0xff] }
 0x160   : > { %1122 = vperm.xlu1 %4430, %v1032_v47   ;;  %1117 = vperm.xlu0 %4429, %v1031_v49   ;;  %v1206_v62 = vld [vmem:[%s6116_s23 + $0x50] sm:$0xff]  ;;  %v1208_v0 = vld [vmem:[%s6116_s23 + $0x60] sm:$0xff]  ;;  %v1211_v1 = vld [vmem:[%s6116_s23 + $0x78] sm:$0xff] }
 0x161   : > { %4038 = vmatprep.subr.msk.mxu1 %vm1387_vm2, %v5108_v58  ;;  %v1210_v3 = vld [vmem:[%s6116_s23 + $0x70] sm:$0xff]  ;;  %v1213_v20 = vld [vmem:[%s6116_s23 + $0x88] sm:$0xff]  ;;  %v1212_v22 = vld [vmem:[%s6116_s23 + $0x80] sm:$0xff] }
 0x162   : > { %3932 = vmatmul.mubr.msk.f32.gmra.mrb[2].mxu1 %vm521_vm0, %v812_v50  ;;  %v1016_v26 = vld [vmem:[%s6037_s11 + $0x8] sm:$0xff]  ;;  %v1022_v29 = vld [vmem:[%s6037_s11 + $0x38] sm:$0xff]  ;;  %v1023_v32 = vld [vmem:[%s6037_s11 + $0x40] sm:$0xff] }
 0x163   : > { %v1018_v30 = vld [vmem:[%s6037_s11 + $0x18] sm:$0xff]  ;;  %v1024_v31 = vld [vmem:[%s6037_s11 + $0x48] sm:$0xff]  ;;  %v1025_v34 = vld [vmem:[%s6037_s11 + $0x50] sm:$0xff] }
 0x164   : > { %1233 = vperm.xlu1 %4430, %v1199_v51   ;;  %1228 = vperm.xlu0 %4429, %v1198_v52   ;;  %v1026_v33 = vld [vmem:[%s6037_s11 + $0x58] sm:$0xff]  ;;  %v1033_v36 = vld [vmem:[%s6037_s11 + $0x90] sm:$0xff]  ;;  %v1197_v37 = vld [vmem:[%s6116_s23 + $0x8] sm:$0xff] }
 0x165   : > { %v1034_v35 = vld [vmem:[%s6037_s11 + $0x98] sm:$0xff]  ;;  %v1196_v38 = vld [vmem:[%s6116_s23] sm:$0xff]  ;;  %v1214_v21 = vld [vmem:[%s6116_s23 + $0x90] sm:$0xff] }
 0x166   : > { %v1215_v19 = vld [vmem:[%s6116_s23 + $0x98] sm:$0xff]  ;;  %v3509_v39 = vld [vmem:[%s6117_s16 + $0x4] sm:$0xf]  ;;  %v5204_v40 = vld [vmem:[%s6117_s16] sm:$0xf] }
 0x167   : > { %3934 = vmatprep.subr.msk.mxu0 %vm1387_vm2, %v3509_v39  ;;  %v5210_v43 = vld [vmem:[#allocation3 + $0x58] sm:$0xff]  ;;  %v5212_v44 = vld [vmem:[#allocation3 + $0x60] sm:$0xff]  ;;  %v5217_v47 = vld [vmem:[#allocation3 + $0x70] sm:$0xff] }
 0x168   : > { %1243 = vperm.xlu1 %4430, %v1201_v53   ;;  %1238 = vperm.xlu0 %4429, %v1200_v54   ;;  %v6052_v45 = vrot.slane %v5210_v43, 7  ;;  %v984_v46 = vrot.slane %v5212_v44, 7  ;;  %v5219_v48 = vld [vmem:[#allocation3 + $0x68] sm:$0xff]  ;;  %v986_v49 = vrot.slane %v5217_v47, 7  ;;  %v5226_v51 = vld [vmem:[#allocation3 + $0x78] sm:$0xff] }
 0x169   : > { %3935 = vmatpush3.msk.msra.mxu0 %vm1387_vm2, %v3509_v39  ;;  %v985_v52 = vrot.slane %v5219_v48, 7  ;;  %v3040_v42 = vld [vmem:[%s6133_s7] sm:$0xf]  ;;  %s3701_s7 = sshll.u32 %s4607_s28, 4 }
 0x16a   : > { %3960 = vmatprep.subr.msk.mxu0 %vm1387_vm2, %v5204_v40  ;;  %v1002_v50 = vsel %vm994_vm3, %v6052_v45, %v984_v46 }
 0x16c   : > { %1253 = vperm.xlu1 %4430, %v1203_v56   ;;  %1248 = vperm.xlu0 %4429, %v1202_v57   ;;  %v5229_v56 = vld [vmem:[#allocation3 + $0x80] sm:$0xff] }
 0x170   : > { %1263 = vperm.xlu1 %4430, %v1205_v59   ;;  %1258 = vperm.xlu0 %4429, %v1204_v60   ;;  %v987_v59 = vrot.slane %v5226_v51, 7  ;;  %v1000_v60 = vsel %vm994_vm3, %v985_v52, %v986_v49 }
 0x174   : > { %1273 = vperm.xlu1 %4430, %v1207_v61   ;;  %1268 = vperm.xlu0 %4429, %v1206_v62   ;;  %v5236_v61 = vld [vmem:[#allocation3 + $0x88] sm:$0xff]  ;;  %v1001_v62 = vsel %vm994_vm3, %v984_v46, %v985_v52 }
 0x175   : > { %v6055_v18 = vrot.slane %v5236_v61, 1 }
 0x178   : > { %1283 = vperm.xlu1 %4430, %v1209_v63   ;;  %1278 = vperm.xlu0 %4429, %v1208_v0   ;;  %v988_v63 = vrot.slane %v5229_v56, 7 }
 0x17c   : > { %1293 = vperm.xlu1 %4430, %v1211_v1   ;;  %1288 = vperm.xlu0 %4429, %v1210_v3   ;;  %v999_v3 = vsel %vm994_vm3, %v986_v49, %v987_v59 }
 0x180   : > { %1303 = vperm.xlu1 %4430, %v1213_v20   ;;  %1298 = vperm.xlu0 %4429, %v1212_v22   ;;  %v6051_v22 = vrot.slane %v5236_v61, 7 }
 0x184   : > { %1057 = vperm.xlu1 %4430, %v1019_v23   ;;  %1037 = vperm.xlu0 %4429, %v1015_v24   ;;  %v998_v24 = vsel %vm994_vm3, %v987_v59, %v988_v63 }
 0x188   : > { %1062 = vperm.xlu1 %4430, %v1020_v25   ;;  %1042 = vperm.xlu0 %4429, %v1016_v26   ;;  %v3598_v25 = vld [vmem:[%s6117_s16 + $0x14] sm:$0xf] }
 0x18c   : > { %1067 = vperm.xlu1 %4430, %v1021_v27   ;;  %1047 = vperm.xlu0 %4429, %v1017_v28   ;;  %v997_v27 = vsel %vm994_vm3, %v988_v63, %v6051_v22 }
 0x190   : > { %1072 = vperm.xlu1 %4430, %v1022_v29   ;;  %1052 = vperm.xlu0 %4429, %v1018_v30  }
 0x194   : > { %1082 = vperm.xlu1 %4430, %v1024_v31   ;;  %1077 = vperm.xlu0 %4429, %v1023_v32   ;;  %v5276_v32 = vld [vmem:[#allocation3 + $0x10] sm:$0xff] }
 0x195   : > { %v6050_v49 = vrot.slane %v5276_v32, 1 }
 0x198   : > { %1092 = vperm.xlu1 %4430, %v1026_v33   ;;  %1087 = vperm.xlu0 %4429, %v1025_v34   ;;  %v5280_v33 = vld [vmem:[#allocation3 + $0x18] sm:$0xff] }
 0x199   : > { %v3616_v34 = vld [vmem:[%s6117_s16 + $0x18] sm:$0xf]  ;;  %v1158_v46 = vrot.slane %v5280_v33, 1  ;;  %v6068_v12 = vrot.slane %v5280_v33, 7 }
 0x19c   : > { %1132 = vperm.xlu1 %4430, %v1034_v35   ;;  %1127 = vperm.xlu0 %4429, %v1033_v36   ;;  %v5291_v35 = vld [vmem:[#allocation3 + $0x28] sm:$0xff]  ;;  %v5296_v36 = vld [vmem:[#allocation3 + $0x30] sm:$0xff] }
 0x1a0   : > { %1223 = vperm.xlu1 %4430, %v1197_v37   ;;  %1218 = vperm.xlu0 %4429, %v1196_v38   ;;  %v5301_v37 = vld [vmem:[#allocation3 + $0x38] sm:$0xff]  ;;  %v5305_v38 = vld [vmem:[#allocation3 + $0x40] sm:$0xff] }
 0x1a1   : > { %v979_v4 = vrot.slane %v5301_v37, 7 }
 0x1a4   : > { %1313 = vperm.xlu1 %4430, %v1215_v19   ;;  %1308 = vperm.xlu0 %4429, %v1214_v21   ;;  %v5309_v19 = vld [vmem:[#allocation3 + $0x48] sm:$0xff]  ;;  %v5313_v21 = vld [vmem:[#allocation3 + $0x50] sm:$0xff] }
 0x1d7   : > { %v1108_v53 = vpop.permute.xlu1 %1107  ;;  %v1098_v54 = vpop.permute.xlu0 %1097 }
 0x1d8   : > { %v5231_v57 = vmul.f32 %v1098_v54, %v1002_v50  ;;  %v5243_v0 = vmul.f32 %v1108_v53, %v1000_v60  ;;  %v1192_v53 = vsel %vm1175_vm4, %v6050_v49, %v1158_v46  ;;  %v1160_v54 = vrot.slane %v5291_v35, 1 }
 0x1da   : > { %4029 = vmatprep.mubr.msk.f32.mxu1 %vm777_vm1, %v5231_v57 }
 0x1db   : > { %v1113_v1 = vpop.permute.xlu1 %1112  ;;  %v1103_v20 = vpop.permute.xlu0 %1102 }
 0x1dc   : > { %v5248_v23 = vmul.f32 %v1103_v20, %v1001_v62  ;;  %v5255_v26 = vmul.f32 %v1113_v1, %v999_v3  ;;  %v1161_v1 = vrot.slane %v5296_v36, 1  ;;  %v1162_v20 = vrot.slane %v5301_v37, 1 }
 0x1de   : > { %4030 = vmatmul.mubr.msk.f32.vlgmr.msra.gmra.mrb[4].mxu1 %vm777_vm1, %v5248_v23 }
 0x1df   : > { %v1118_v28 = vpop.permute.xlu0 %1117  ;;  %4032 = vmatprep.mubr.msk.f32.mxu1 %vm777_vm1, %v5243_v0  ;;  %4039 = vmatpush3.msk.msra.mxu1 %vm1387_vm2, %v5108_v58  ;;  %v1123_v30 = vpop.permute.xlu1 %1122  ;;  %v5284_v58 = vld [vmem:[#allocation3 + $0x20] sm:$0xff] }
 0x1e0   : > { %v5267_v29 = vmul.f32 %v1118_v28, %v998_v24  ;;  %4064 = vmatprep.subr.msk.mxu1 %vm1387_vm2, %v3598_v25  ;;  %v5270_v31 = vmul.f32 %v1123_v30, %v997_v27  ;;  %v1159_v52 = vrot.slane %v5284_v58, 1  ;;  %v1163_v30 = vrot.slane %v5305_v38, 1 }
 0x1e2   : > { %4033 = vmatmul.mubr.msk.f32.gmra.mrb[6].mxu1 %vm777_vm1, %v5255_v26  ;;  %v1191_v62 = vsel %vm1175_vm4, %v1158_v46, %v1159_v52  ;;  %v1190_v3 = vsel %vm1175_vm4, %v1159_v52, %v1160_v54  ;;  %v5365_v52 = vld [vmem:[%s6117_s16 + $0x1c] sm:$0xf] }
 0x1e3   : > { %4035 = vmatprep.mubr.msk.f32.mxu1 %vm777_vm1, %v5267_v29  ;;  %v1229_v39 = vpop.permute.xlu0 %1228  ;;  %v1234_v41 = vpop.permute.xlu1 %1233 }
 0x1e4   : > { %v5340_v63 = vmul.f32 %v1229_v39, %v1192_v53  ;;  %v5348_v24 = vmul.f32 %v1234_v41, %v1191_v62  ;;  %v1188_v39 = vsel %vm1175_vm4, %v1161_v1, %v1162_v20  ;;  %v1164_v41 = vrot.slane %v5309_v19, 1 }
 0x1e6   : > { %4036 = vmatmul.mubr.msk.f32.gmra.mrb[8].mxu1 %vm777_vm1, %v5270_v31  ;;  %v1186_v62 = vsel %vm1175_vm4, %v1163_v30, %v1164_v41 }
 0x1e7   : > { %4040 = vmatprep.mubr.msk.f32.mxu1 %vm777_vm1, %v5276_v32  ;;  %v1239_v50 = vpop.permute.xlu0 %1238  ;;  %v1244_v59 = vpop.permute.xlu1 %1243 }
 0x1e8   : > { %v5354_v27 = vmul.f32 %v1239_v50, %v1190_v3  ;;  %v1187_v50 = vsel %vm1175_vm4, %v1162_v20, %v1163_v30  ;;  %v1166_v20 = vrot.slane %v5210_v43, 1 }
 0x1ea   : > { %4041 = vmatmul.mubr.msk.f32.vlgmr.msra.gmra.mrb[10].mxu1 %vm777_vm1, %v5280_v33 }
 0x1eb   : > { %4043 = vmatprep.mubr.msk.f32.mxu1 %vm777_vm1, %v5284_v58  ;;  %4065 = vmatpush3.msk.msra.mxu1 %vm1387_vm2, %v3598_v25  ;;  %v1249_v60 = vpop.permute.xlu0 %1248  ;;  %v1189_v25 = vsel %vm1175_vm4, %v1160_v54, %v1161_v1  ;;  %v1254_v28 = vpop.permute.xlu1 %1253  ;;  %v1165_v1 = vrot.slane %v5313_v21, 1 }
 0x1ec   : > { %4090 = vmatprep.subr.msk.mxu1 %vm1387_vm2, %v3616_v34  ;;  %v5367_v53 = vmul.f32 %v1244_v59, %v1189_v25  ;;  %v5373_v54 = vmul.f32 %v1249_v60, %v1188_v39  ;;  %v5383_v3 = vmul.f32 %v1254_v28, %v1187_v50  ;;  %v1167_v39 = vrot.slane %v5212_v44, 1 }
 0x1ed   : > { %v1184_v28 = vsel %vm1175_vm4, %v1165_v1, %v1166_v20  ;;  %v1168_v50 = vrot.slane %v5219_v48, 1 }
 0x1ee   : > { %4044 = vmatmul.mubr.msk.f32.gmra.mrb[12].mxu1 %vm777_vm1, %v5291_v35 }
 0x1ef   : > { %4046 = vmatprep.mubr.msk.f32.mxu1 %vm777_vm1, %v5296_v36  ;;  %v1259_v46 = vpop.permute.xlu0 %1258  ;;  %v1264_v59 = vpop.permute.xlu1 %1263 }
 0x1f0   : > { %v5390_v25 = vmul.f32 %v1259_v46, %v1186_v62  ;;  %v1183_v46 = vsel %vm1175_vm4, %v1166_v20, %v1167_v39 }
 0x1f2   : > { %4047 = vmatmul.mubr.msk.f32.gmra.mrb[14].mxu1 %vm777_vm1, %v5301_v37 }
 0x1f3   : > { %4049 = vmatprep.mubr.msk.f32.mxu1 %vm777_vm1, %v5305_v38  ;;  %v1269_v60 = vpop.permute.xlu0 %1268  ;;  %v1274_v49 = vpop.permute.xlu1 %1273 }
 0x1f4   : > { %v5406_v62 = vmul.f32 %v1269_v60, %v1184_v28  ;;  %v5416_v22 = vmul.f32 %v1274_v49, %v1183_v46  ;;  %v1171_v28 = vrot.slane %v5229_v56, 1 }
 0x1f6   : > { %4050 = vmatmul.mubr.msk.f32.gmra.mrb[16].mxu1 %vm777_vm1, %v5309_v19  ;;  %v1178_v46 = vsel %vm1175_vm4, %v1171_v28, %v6055_v18 }
 0x1f7   : > { %4052 = vmatprep.mubr.msk.f32.mxu1 %vm777_vm1, %v5313_v21  ;;  %v1284_v45 = vpop.permute.xlu1 %1283 }
 0x1fa   : > { %4053 = vmatmul.mubr.msk.f32.gmra.mrb[18].mxu1 %vm777_vm1, %v5210_v43 }
 0x1fb   : > { %4055 = vmatprep.mubr.msk.f32.mxu1 %vm777_vm1, %v5212_v44 }
 0x1fe   : > { %4056 = vmatmul.mubr.msk.f32.gmra.mrb[4].mxu1 %vm777_vm1, %v5219_v48 }
 0x1ff   : > { %4058 = vmatprep.mubr.msk.f32.mxu1 %vm777_vm1, %v5217_v47 }
 0x202   : > { %4059 = vmatmul.mubr.msk.f32.gmra.mrb[6].mxu1 %vm777_vm1, %v5226_v51 }
 0x203   : > { %4061 = vmatprep.mubr.msk.f32.mxu1 %vm777_vm1, %v5229_v56 }
 0x206   : > { %4062 = vmatmul.mubr.msk.f32.gmra.mrb[8].mxu1 %vm777_vm1, %v5236_v61 }
 0x207   : > { %4066 = vmatprep.mubr.msk.f32.mxu1 %vm777_vm1, %v5340_v63 }
 0x20a   : > { %4067 = vmatmul.mubr.msk.f32.vlgmr.msra.gmra.mrb[10].mxu1 %vm777_vm1, %v5348_v24 }
 0x20b   : > { %4069 = vmatprep.mubr.msk.f32.mxu1 %vm777_vm1, %v5354_v27  ;;  %4091 = vmatpush3.msk.msra.mxu1 %vm1387_vm2, %v3616_v34  ;;  %v1185_v34 = vsel %vm1175_vm4, %v1164_v41, %v1165_v1  ;;  %v1279_v41 = vpop.permute.xlu0 %1278  ;;  %v1182_v1 = vsel %vm1175_vm4, %v1167_v39, %v1168_v50 }
 0x20c   : > { %4116 = vmatprep.subr.msk.mxu1 %vm1387_vm2, %v5365_v52  ;;  %v5394_v30 = vmul.f32 %v1264_v59, %v1185_v34  ;;  %v1169_v59 = vrot.slane %v5217_v47, 1  ;;  %v1170_v34 = vrot.slane %v5226_v51, 1  ;;  %v5420_v60 = vmul.f32 %v1279_v41, %v1182_v1 }
 0x20e   : > { %4070 = vmatmul.mubr.msk.f32.gmra.mrb[12].mxu1 %vm777_vm1, %v5367_v53  ;;  %v1181_v20 = vsel %vm1175_vm4, %v1168_v50, %v1169_v59  ;;  %v1180_v39 = vsel %vm1175_vm4, %v1169_v59, %v1170_v34  ;;  %v1179_v50 = vsel %vm1175_vm4, %v1170_v34, %v1171_v28  ;;  %v1294_v59 = vpop.permute.xlu1 %1293  ;;  %v3508_v28 = vld [vmem:[%s6032_s6] ss:$0 sm:$0xff] }
 0x20f   : > { %4072 = vmatprep.mubr.msk.f32.mxu1 %vm777_vm1, %v5373_v54  ;;  %v1289_v17 = vpop.permute.xlu0 %1288  ;;  %v5430_v49 = vmul.f32 %v1284_v45, %v1181_v20  ;;  %v5444_v45 = vmul.f32 %v1294_v59, %v1179_v50 }
 0x210   : > { %v5434_v41 = vmul.f32 %v1289_v17, %v1180_v39  ;;  %v3507_v17 = vld [vmem:[%s6031_s5] ss:$0 sm:$0xff] }
 0x211   : > { %6119 = vst [vmem:[#allocation40_spill] sm:$0xff] %v5444_v45 }
 0x212   : > { %4073 = vmatmul.mubr.msk.f32.gmra.mrb[14].mxu1 %vm777_vm1, %v5383_v3  ;;  %6118 = vst [vmem:[#allocation39_spill] sm:$0xff] %v5434_v41  ;;  %v1304_v39 = vpop.permute.xlu1 %1303 }
 0x213   : > { %4075 = vmatprep.mubr.msk.f32.mxu1 %vm777_vm1, %v5390_v25  ;;  %v1299_v1 = vpop.permute.xlu0 %1298 }
 0x214   : > { %v5446_v20 = vmul.f32 %v1299_v1, %v1178_v46  ;;  %v939_v46 = vstv %s938_s8  ;;  %s3694_s8 = sshll.u32 %s4611_s29, 5  ;;  %s3348_s29 = sshll.u32 %s5040_s14, 4  ;;  %s5968_s29 = int_to_ptr.vmem [resolvable:$true] %s3348_s29 }
 0x215   : > { %vm940_vm5 = vcmp.eq.s32.totalorder %v939_v46, 1  ;;  %s3345_s19 = sadd.s32 %s3701_s7, %s3694_s8  ;;  %s4517_s20 = scalar_lea.vmem %s5968_s29, 2048 }
 0x216   : > { %4076 = vmatmul.mubr.msk.f32.gmra.mrb[16].mxu1 %vm777_vm1, %v5394_v30  ;;  %6120 = vst [vmem:[#allocation41_spill] sm:$0xff] %v5446_v20  ;;  %v1058_v8 = vpop.permute.xlu1 %1057  ;;  %s3695_s28 = sshll.u32 %s3345_s19, 7  ;;  %p4518_p13 = scmp.ne.s32.totalorder %s5968_s29, %s4517_s20 }
 0x217   : > { %4078 = vmatprep.mubr.msk.f32.mxu1 %vm777_vm1, %v5406_v62  ;;  %v5462_v15 = vpop.permute.xlu0 %1037 }
 0x218   : > { %p4519_p10 = pnand %p4518_p13, %p6155_p4 }
 0x21a   : > { %4079 = vmatmul.mubr.msk.f32.gmra.mrb[18].mxu1 %vm777_vm1, %v5416_v22  ;;  %p4520_p8 = pneg %p4519_p10 }
 0x21b   : > { %4081 = vmatprep.mubr.msk.f32.mxu1 %vm777_vm1, %v5420_v60  ;;  %v5466_v46 = vpop.permute.xlu0 %1042 }
 0x21e   : > { %4082 = vmatmul.mubr.msk.f32.gmra.mrb[4].mxu1 %vm777_vm1, %v5430_v49 }
 0x21f   : > { %4084 = vmatprep.mubr.msk.f32.mxu1 %vm777_vm1, %v5434_v41 }
 0x222   : > { %4085 = vmatmul.mubr.msk.f32.gmra.mrb[6].mxu1 %vm777_vm1, %v5444_v45  ;;  %v980_v45 = vrot.slane %v5305_v38, 7 }
 0x223   : > { %4087 = vmatprep.mubr.msk.f32.mxu1 %vm777_vm1, %v5446_v20 }
 0x231   : > { %v3930_v34 = vpop.f32.mrb[0].mxu1 }
 0x232   : > { %v920_v50 = vmul.f32 %v3930_v34, %v3507_v17  ;;  %v893_v59 = vpop.f32.mrb[1].mxu1 }
 0x233   : > { %v919_v1 = vmul.f32 %v3507_v17, %v893_v59 }
 0x234   : > { %v931_v18 = vadd.f32 %v3508_v28, %v920_v50 }
 0x235   : > { %v930_v16 = vadd.f32 %v3508_v28, %v919_v1  ;;  %v3933_v13 = vpop.f32.mrb[2].mxu1 }
 0x236   : > { %v935_v14 = vmax.f32 %v931_v18, 0.0  ;;  %v922_v11 = vmul.f32 %v3933_v13, %v3507_v17  ;;  %v903_v9 = vpop.f32.mrb[3].mxu1 }
 0x237   : > { %v934_v10 = vmax.f32 %v930_v16, 0.0  ;;  %v921_v7 = vmul.f32 %v3507_v17, %v903_v9  ;;  %v1063_v16 = vpop.permute.xlu1 %1062  ;;  %v5470_v9 = vpop.permute.xlu0 %1047  ;;  %v977_v17 = vrot.slane %v5291_v35, 7 }
 0x238   : > { %v942_v5 = vsel %vm940_vm5, %v935_v14, 0.0  ;;  %v933_v34 = vadd.f32 %v3508_v28, %v922_v11 }
 0x239   : > { %944 = vst.msk [vmem:[#allocation3 + $0x8] sm:$0xff] %vm777_vm1, %v942_v5  ;;  %v941_v6 = vsel %vm940_vm5, %v934_v10, 0.0  ;;  %v932_v59 = vadd.f32 %v3508_v28, %v921_v7  ;;  %v976_v7 = vrot.slane %v5284_v58, 7 }
 0x23a   : > { %943 = vst.msk [vmem:[#allocation3] sm:$0xff] %vm777_vm1, %v941_v6  ;;  %v937_v50 = vmax.f32 %v933_v34, 0.0  ;;  %v5481_v6 = vld [vmem:[%s6117_s16 + $0x8] sm:$0xf] }
 0x23b   : > { %v936_v1 = vmax.f32 %v932_v59, 0.0  ;;  %v1068_v10 = vpop.permute.xlu1 %1067  ;;  %v1010_v34 = vsel %vm994_vm3, %v6068_v12, %v976_v7  ;;  %v5502_v59 = vpop.permute.xlu0 %1052  ;;  %v1009_v12 = vsel %vm994_vm3, %v976_v7, %v977_v17 }
 0x23c   : > { %v949_v18 = vsel %vm947_vm6, %v937_v50, 0.0  ;;  %v6122_v50 = vrot.slane %v5236_v61, 1 }
 0x23d   : > { %951 = vst.msk [vmem:[#allocation3 + $0x98] sm:$0xff] %vm777_vm1, %v949_v18  ;;  %v948_v13 = vsel %vm947_vm6, %v936_v1, 0.0 }
 0x23e   : > { %950 = vst.msk [vmem:[#allocation3 + $0x90] sm:$0xff] %vm777_vm1, %v948_v13  ;;  %v5516_v13 = vmul.f32 %v1058_v8, %v1010_v34  ;;  %v5532_v8 = vmul.f32 %v1063_v16, %v1009_v12  ;;  %v981_v34 = vrot.slane %v5309_v19, 7 }
 0x23f   : > { %v1073_v2 = vpop.permute.xlu1 %1072 }
 0x240   : > { %v5476_v5 = vld [vmem:[#allocation3 + $0x8] sm:$0xff] }
 0x241   : > { %v5472_v11 = vld [vmem:[#allocation3] sm:$0xff] }
 0x242   : > { %3936 = vmatprep.mubr.msk.f32.mxu0 %vm777_vm1, %v5472_v11 }
 0x243   : > { %3937 = vmatmul.mubr.msk.f32.vlgmr.msra.gmra.mrb[16].mxu0 %vm777_vm1, %v5476_v5  ;;  %v1083_v16 = vpop.permute.xlu1 %1082 }
 0x244   : > { %3961 = vmatpush3.msk.msra.mxu0 %vm1387_vm2, %v5204_v40  ;;  %3939 = vmatprep.mubr.msk.f32.mxu0 %vm777_vm1, %v5276_v32  ;;  %v978_v40 = vrot.slane %v5296_v36, 7 }
 0x245   : > { %v5491_v14 = vld [vmem:[#allocation3 + $0x90] sm:$0xff]  ;;  %3986 = vmatprep.subr.msk.mxu0 %vm1387_vm2, %v5481_v6 }
 0x246   : > { %v6074_v28 = vrot.slane %v5491_v14, 1  ;;  %v1008_v20 = vsel %vm994_vm3, %v977_v17, %v978_v40  ;;  %v1007_v17 = vsel %vm994_vm3, %v978_v40, %v979_v4 }
 0x247   : > { %3940 = vmatmul.mubr.msk.f32.gmra.mrb[18].mxu0 %vm777_vm1, %v5280_v33  ;;  %v5534_v7 = vmul.f32 %v1068_v10, %v1008_v20  ;;  %v5549_v20 = vld [vmem:[%s6117_s16 + $0x20] sm:$0xf]  ;;  %v1005_v10 = vsel %vm994_vm3, %v980_v45, %v981_v34 }
 0x248   : > { %3942 = vmatprep.mubr.msk.f32.mxu0 %vm777_vm1, %v5284_v58  ;;  %v1177_v1 = vsel %vm1175_vm4, %v6122_v50, %v6074_v28  ;;  %v1006_v50 = vsel %vm994_vm3, %v979_v4, %v980_v45  ;;  %v5555_v4 = vmul.f32 %v1073_v2, %v1007_v17  ;;  %v5575_v2 = vld [vmem:[#allocation3 + $0x98] sm:$0xff]  ;;  %v1093_v45 = vpop.permute.xlu1 %1092 }
 0x249   : > { %v5514_v18 = vmul.f32 %v1304_v39, %v1177_v1  ;;  %v1078_v39 = vpop.permute.xlu0 %1077  ;;  %v982_v1 = vrot.slane %v5313_v21, 7 }
 0x24a   : > { %v5561_v12 = vmul.f32 %v1078_v39, %v1006_v50  ;;  %v6124_v39 = vrot.slane %v5210_v43, 7  ;;  %v991_v50 = vrot.slane %v5575_v2, 7 }
 0x24b   : > { %6123 = vst [vmem:[#allocation42_spill] sm:$0xff] %v5514_v18  ;;  %3943 = vmatmul.mubr.msk.f32.gmra.mrb[20].mxu0 %vm777_vm1, %v5291_v35  ;;  %4088 = vmatmul.mubr.msk.f32.gmra.mrb[8].mxu1 %vm777_vm1, %v5514_v18  ;;  %v1004_v28 = vsel %vm994_vm3, %v981_v34, %v982_v1  ;;  %v990_v18 = vrot.slane %v5491_v14, 7 }
 0x24c   : > { %4092 = vmatprep.mubr.msk.f32.mxu1 %vm777_vm1, %v5516_v13  ;;  %3945 = vmatprep.mubr.msk.f32.mxu0 %vm777_vm1, %v5296_v36  ;;  %v1003_v17 = vsel %vm994_vm3, %v982_v1, %v6124_v39  ;;  %v972_v1 = vrot.slane %v5472_v11, 7 }
 0x24d   : > { %v1088_v40 = vpop.permute.xlu0 %1087 }
 0x24e   : > { %v5583_v34 = vmul.f32 %v1088_v40, %v1004_v28  ;;  %v973_v28 = vrot.slane %v5476_v5, 7  ;;  %v974_v40 = vrot.slane %v5276_v32, 7 }
 0x24f   : > { %3946 = vmatmul.mubr.msk.f32.gmra.mrb[22].mxu0 %vm777_vm1, %v5301_v37  ;;  %4093 = vmatmul.mubr.msk.f32.vlgmr.msra.gmra.mrb[10].mxu1 %vm777_vm1, %v5532_v8 }
 0x250   : > { %4095 = vmatprep.mubr.msk.f32.mxu1 %vm777_vm1, %v5534_v7  ;;  %3948 = vmatprep.mubr.msk.f32.mxu0 %vm777_vm1, %v5305_v38 }
 0x251   : > { %4117 = vmatpush3.msk.msra.mxu1 %vm1387_vm2, %v5365_v52  ;;  %v5577_v52 = vmul.f32 %v1083_v16, %v1005_v10  ;;  %v5594_v16 = vmul.f32 %v1093_v45, %v1003_v17  ;;  %v1014_v10 = vsel %vm994_vm3, %v991_v50, %v972_v1  ;;  %v1013_v45 = vsel %vm994_vm3, %v972_v1, %v973_v28 }
 0x252   : > { %4142 = vmatprep.subr.msk.mxu1 %vm1387_vm2, %v5549_v20  ;;  %v1135_v39 = vmul.f32 %v5462_v15, %v1014_v10  ;;  %v1012_v17 = vsel %vm994_vm3, %v973_v28, %v974_v40  ;;  %v1136_v1 = vmul.f32 %v5466_v46, %v1013_v45  ;;  %v6125_v15 = vrot.slane %v5280_v33, 7  ;;  %v1128_v46 = vpop.permute.xlu0 %1127 }
 0x253   : > { %3949 = vmatmul.mubr.msk.f32.gmra.mrb[24].mxu0 %vm777_vm1, %v5309_v19  ;;  %4096 = vmatmul.mubr.msk.f32.gmra.mrb[12].mxu1 %vm777_vm1, %v5555_v4  ;;  %v5628_v41 = vmul.f32 %v5470_v9, %v1012_v17  ;;  %v6126_v28 = vrot.slane %v5236_v61, 7 }
 0x254   : > { %4098 = vmatprep.mubr.msk.f32.mxu1 %vm777_vm1, %v5561_v12  ;;  %3951 = vmatprep.mubr.msk.f32.mxu0 %vm777_vm1, %v5313_v21  ;;  %v1011_v10 = vsel %vm994_vm3, %v974_v40, %v6125_v15  ;;  %v995_v40 = vsel %vm994_vm3, %v990_v18, %v991_v50 }
 0x255   : > { %v5642_v33 = vmul.f32 %v5502_v59, %v1011_v10 }
 0x257   : > { %3952 = vmatmul.mubr.msk.f32.gmra.mrb[26].mxu0 %vm777_vm1, %v5210_v43  ;;  %4099 = vmatmul.mubr.msk.f32.gmra.mrb[14].mxu1 %vm777_vm1, %v5577_v52 }
 0x258   : > { %4101 = vmatprep.mubr.msk.f32.mxu1 %vm777_vm1, %v5583_v34  ;;  %3954 = vmatprep.mubr.msk.f32.mxu0 %vm777_vm1, %v5212_v44 }
 0x25b   : > { %3955 = vmatmul.mubr.msk.f32.gmra.mrb[28].mxu0 %vm777_vm1, %v5219_v48  ;;  %4102 = vmatmul.mubr.msk.f32.gmra.mrb[16].mxu1 %vm777_vm1, %v5594_v16 }
 0x25c   : > { %4104 = vmatprep.mubr.msk.f32.mxu1 %vm777_vm1, %v5231_v57  ;;  %3957 = vmatprep.mubr.msk.f32.mxu0 %vm777_vm1, %v5217_v47 }
 0x25f   : > { %3958 = vmatmul.mubr.msk.f32.gmra.mrb[30].mxu0 %vm777_vm1, %v5226_v51  ;;  %4105 = vmatmul.mubr.msk.f32.gmra.mrb[18].mxu1 %vm777_vm1, %v5248_v23 }
 0x260   : > { %3962 = vmatprep.mubr.msk.f32.mxu0 %vm777_vm1, %v1135_v39  ;;  %4107 = vmatprep.mubr.msk.f32.mxu1 %vm777_vm1, %v5243_v0  ;;  %v996_v39 = vsel %vm994_vm3, %v6126_v28, %v990_v18  ;;  %v5819_v18 = vld [vmem:[%s6134_s21] ss:$0 sm:$0xff] }
 0x261   : > { %v1153_v9 = vmul.f32 %v1128_v46, %v996_v39 }
 0x263   : > { %3963 = vmatmul.mubr.msk.f32.vlgmr.msra.gmra.mrb[16].mxu0 %vm777_vm1, %v1136_v1  ;;  %4108 = vmatmul.mubr.msk.f32.gmra.mrb[4].mxu1 %vm777_vm1, %v5255_v26 }
 0x264   : > { %3987 = vmatpush3.msk.msra.mxu0 %vm1387_vm2, %v5481_v6  ;;  %3965 = vmatprep.mubr.msk.f32.mxu0 %vm777_vm1, %v5628_v41  ;;  %v1133_v6 = vpop.permute.xlu1 %1132 }
 0x265   : > { %4110 = vmatprep.mubr.msk.f32.mxu1 %vm777_vm1, %v5267_v29  ;;  %4012 = vmatprep.subr.msk.mxu0 %vm1387_vm2, %v5093_v55  ;;  %v1154_v29 = vmul.f32 %v1133_v6, %v995_v40 }
 0x267   : > { %3966 = vmatmul.mubr.msk.f32.gmra.mrb[18].mxu0 %vm777_vm1, %v5642_v33  ;;  %4111 = vmatmul.mubr.msk.f32.gmra.mrb[6].mxu1 %vm777_vm1, %v5270_v31  ;;  %v1155_v31 = vrot.slane %v5472_v11, 1 }
 0x268   : > { %3968 = vmatprep.mubr.msk.f32.mxu0 %vm777_vm1, %v5516_v13  ;;  %4113 = vmatprep.mubr.msk.f32.mxu1 %vm777_vm1, %v1153_v9 }
 0x26b   : > { %3969 = vmatmul.mubr.msk.f32.gmra.mrb[20].mxu0 %vm777_vm1, %v5532_v8  ;;  %4114 = vmatmul.mubr.msk.f32.gmra.mrb[8].mxu1 %vm777_vm1, %v1154_v29 }
 0x26c   : > { %3971 = vmatprep.mubr.msk.f32.mxu0 %vm777_vm1, %v5534_v7  ;;  %4118 = vmatprep.mubr.msk.f32.mxu1 %vm777_vm1, %v5284_v58  ;;  %v1156_v58 = vrot.slane %v5476_v5, 1 }
 0x26f   : > { %3972 = vmatmul.mubr.msk.f32.gmra.mrb[22].mxu0 %vm777_vm1, %v5555_v4  ;;  %4119 = vmatmul.mubr.msk.f32.vlgmr.msra.gmra.mrb[10].mxu1 %vm777_vm1, %v5291_v35  ;;  %v1194_v35 = vsel %vm1175_vm4, %v1155_v31, %v1156_v58 }
 0x270   : > { %3974 = vmatprep.mubr.msk.f32.mxu0 %vm777_vm1, %v5561_v12  ;;  %4121 = vmatprep.mubr.msk.f32.mxu1 %vm777_vm1, %v5296_v36  ;;  %v1219_v36 = vpop.permute.xlu0 %1218 }
 0x271   : > { %4143 = vmatpush3.msk.msra.mxu1 %vm1387_vm2, %v5549_v20 }
 0x273   : > { %3975 = vmatmul.mubr.msk.f32.gmra.mrb[24].mxu0 %vm777_vm1, %v5577_v52  ;;  %4122 = vmatmul.mubr.msk.f32.gmra.mrb[12].mxu1 %vm777_vm1, %v5301_v37 }
 0x274   : > { %3977 = vmatprep.mubr.msk.f32.mxu0 %vm777_vm1, %v5583_v34  ;;  %4124 = vmatprep.mubr.msk.f32.mxu1 %vm777_vm1, %v5305_v38  ;;  %v1316_v38 = vmul.f32 %v1219_v36, %v1194_v35 }
 0x277   : > { %3978 = vmatmul.mubr.msk.f32.gmra.mrb[26].mxu0 %vm777_vm1, %v5594_v16  ;;  %4125 = vmatmul.mubr.msk.f32.gmra.mrb[14].mxu1 %vm777_vm1, %v5309_v19 }
 0x278   : > { %3980 = vmatprep.mubr.msk.f32.mxu0 %vm777_vm1, %v5231_v57  ;;  %4127 = vmatprep.mubr.msk.f32.mxu1 %vm777_vm1, %v5313_v21  ;;  %v6127_v57 = vrot.slane %v5276_v32, 1 }
 0x27a   : > { %v1193_v37 = vsel %vm1175_vm4, %v1156_v58, %v6127_v57 }
 0x27b   : > { %3981 = vmatmul.mubr.msk.f32.gmra.mrb[28].mxu0 %vm777_vm1, %v5248_v23  ;;  %4128 = vmatmul.mubr.msk.f32.gmra.mrb[16].mxu1 %vm777_vm1, %v5210_v43  ;;  %v1224_v43 = vpop.permute.xlu1 %1223 }
 0x27c   : > { %3983 = vmatprep.mubr.msk.f32.mxu0 %vm777_vm1, %v5243_v0  ;;  %4130 = vmatprep.mubr.msk.f32.mxu1 %vm777_vm1, %v5212_v44  ;;  %v1317_v44 = vmul.f32 %v1224_v43, %v1193_v37  ;;  %v1309_v0 = vpop.permute.xlu0 %1308 }
 0x27f   : > { %3984 = vmatmul.mubr.msk.f32.gmra.mrb[30].mxu0 %vm777_vm1, %v5255_v26  ;;  %4131 = vmatmul.mubr.msk.f32.gmra.mrb[18].mxu1 %vm777_vm1, %v5219_v48  ;;  %v1174_v48 = vrot.slane %v5575_v2, 1  ;;  %v6132_v26 = vld [vmem:[#allocation42_spill] sm:$0xff]  ;;  %v1314_v32 = vpop.permute.xlu1 %1313 }
 0x280   : > { %3988 = vmatprep.mubr.msk.f32.mxu0 %vm777_vm1, %v1316_v38  ;;  %4133 = vmatprep.mubr.msk.f32.mxu1 %vm777_vm1, %v5217_v47  ;;  %v6129_v47 = vld [vmem:[#allocation40_spill] sm:$0xff] }
 0x281   : > { %v1195_v23 = vsel %vm1175_vm4, %v1174_v48, %v1155_v31 }
 0x282   : > { %v1335_v19 = vmul.f32 %v1314_v32, %v1195_v23 }
 0x283   : > { %3989 = vmatmul.mubr.msk.f32.vlgmr.msra.gmra.mrb[16].mxu0 %vm777_vm1, %v1317_v44  ;;  %4134 = vmatmul.mubr.msk.f32.gmra.mrb[4].mxu1 %vm777_vm1, %v5226_v51  ;;  %v6130_v51 = vrot.slane %v5491_v14, 1 }
 0x284   : > { %4013 = vmatpush3.msk.msra.mxu0 %vm1387_vm2, %v5093_v55  ;;  %3991 = vmatprep.mubr.msk.f32.mxu0 %vm777_vm1, %v5340_v63  ;;  %v6128_v55 = vld [vmem:[#allocation39_spill] sm:$0xff] }
 0x285   : > { %4136 = vmatprep.mubr.msk.f32.mxu1 %vm777_vm1, %v5229_v56  ;;  %v1176_v56 = vsel %vm1175_vm4, %v6130_v51, %v1174_v48  ;;  %4168 = vmatprep.subr.msk.mxu0 %vm1387_vm2, %v3040_v42 }
 0x287   : > { %3992 = vmatmul.mubr.msk.f32.gmra.mrb[18].mxu0 %vm777_vm1, %v5348_v24  ;;  %4137 = vmatmul.mubr.msk.f32.gmra.mrb[6].mxu1 %vm777_vm1, %v5236_v61  ;;  %v6131_v61 = vld [vmem:[#allocation41_spill] sm:$0xff] }
 0x288   : > { %3994 = vmatprep.mubr.msk.f32.mxu0 %vm777_vm1, %v5354_v27  ;;  %4139 = vmatprep.mubr.msk.f32.mxu1 %vm777_vm1, %v5491_v14 }
 0x28b   : > { %3995 = vmatmul.mubr.msk.f32.gmra.mrb[20].mxu0 %vm777_vm1, %v5367_v53  ;;  %4140 = vmatmul.mubr.msk.f32.gmra.mrb[8].mxu1 %vm777_vm1, %v5575_v2 }
 0x28c   : > { %3997 = vmatprep.mubr.msk.f32.mxu0 %vm777_vm1, %v5373_v54  ;;  %4144 = vmatprep.mubr.msk.f32.mxu1 %vm777_vm1, %v5354_v27 }
 0x28f   : > { %3998 = vmatmul.mubr.msk.f32.gmra.mrb[22].mxu0 %vm777_vm1, %v5383_v3  ;;  %4145 = vmatmul.mubr.msk.f32.vlgmr.msra.gmra.mrb[10].mxu1 %vm777_vm1, %v5367_v53 }
 0x290   : > { %4000 = vmatprep.mubr.msk.f32.mxu0 %vm777_vm1, %v5390_v25  ;;  %4147 = vmatprep.mubr.msk.f32.mxu1 %vm777_vm1, %v5373_v54 }
 0x293   : > { %4001 = vmatmul.mubr.msk.f32.gmra.mrb[24].mxu0 %vm777_vm1, %v5394_v30  ;;  %4148 = vmatmul.mubr.msk.f32.gmra.mrb[12].mxu1 %vm777_vm1, %v5383_v3 }
 0x294   : > { %4003 = vmatprep.mubr.msk.f32.mxu0 %vm777_vm1, %v5406_v62  ;;  %4150 = vmatprep.mubr.msk.f32.mxu1 %vm777_vm1, %v5390_v25 }
 0x297   : > { %4004 = vmatmul.mubr.msk.f32.gmra.mrb[26].mxu0 %vm777_vm1, %v5416_v22  ;;  %4151 = vmatmul.mubr.msk.f32.gmra.mrb[14].mxu1 %vm777_vm1, %v5394_v30 }
 0x298   : > { %4006 = vmatprep.mubr.msk.f32.mxu0 %vm777_vm1, %v5420_v60  ;;  %4153 = vmatprep.mubr.msk.f32.mxu1 %vm777_vm1, %v5406_v62 }
 0x29b   : > { %4007 = vmatmul.mubr.msk.f32.gmra.mrb[28].mxu0 %vm777_vm1, %v5430_v49  ;;  %4154 = vmatmul.mubr.msk.f32.gmra.mrb[16].mxu1 %vm777_vm1, %v5416_v22  ;;  %v1334_v22 = vmul.f32 %v1309_v0, %v1176_v56 }
 0x29c   : > { %4009 = vmatprep.mubr.msk.f32.mxu0 %vm777_vm1, %v6128_v55  ;;  %4156 = vmatprep.mubr.msk.f32.mxu1 %vm777_vm1, %v5420_v60 }
 0x29f   : > { %4010 = vmatmul.mubr.msk.f32.gmra.mrb[30].mxu0 %vm777_vm1, %v6129_v47  ;;  %4157 = vmatmul.mubr.msk.f32.gmra.mrb[18].mxu1 %vm777_vm1, %v5430_v49 }
 0x2a0   : > { %4014 = vmatprep.mubr.msk.f32.mxu0 %vm777_vm1, %v5628_v41  ;;  %4159 = vmatprep.mubr.msk.f32.mxu1 %vm777_vm1, %v6128_v55 }
 0x2a3   : > { %4015 = vmatmul.mubr.msk.f32.vlgmr.msra.gmra.mrb[16].mxu0 %vm777_vm1, %v5642_v33  ;;  %4160 = vmatmul.mubr.msk.f32.gmra.mrb[4].mxu1 %vm777_vm1, %v6129_v47 }
 0x2a4   : > { %4017 = vmatprep.mubr.msk.f32.mxu0 %vm777_vm1, %v5516_v13  ;;  %4162 = vmatprep.mubr.msk.f32.mxu1 %vm777_vm1, %v6131_v61 }
 0x2a5   : > { %4169 = vmatpush3.msk.msra.mxu0 %vm1387_vm2, %v3040_v42 }
 0x2a7   : > { %4018 = vmatmul.mubr.msk.f32.gmra.mrb[18].mxu0 %vm777_vm1, %v5532_v8  ;;  %4163 = vmatmul.mubr.msk.f32.gmra.mrb[6].mxu1 %vm777_vm1, %v6132_v26 }
 0x2a8   : > { %4020 = vmatprep.mubr.msk.f32.mxu0 %vm777_vm1, %v5534_v7  ;;  %4165 = vmatprep.mubr.msk.f32.mxu1 %vm777_vm1, %v1334_v22 }
 0x2ab   : > { %4021 = vmatmul.mubr.msk.f32.gmra.mrb[20].mxu0 %vm777_vm1, %v5555_v4  ;;  %4166 = vmatmul.mubr.msk.f32.gmra.mrb[8].mxu1 %vm777_vm1, %v1335_v19 }
 0x2ac   : > { %4023 = vmatprep.mubr.msk.f32.mxu0 %vm777_vm1, %v5561_v12  ;;  %v5824_v12 = vld [vmem:[%s6135_s1] ss:$0 sm:$0xff]  ;;  %s5966_s1 = scalar_lea.hbm %s6154_s17, %s3695_s28 }
 0x2af   : > { %4024 = vmatmul.mubr.msk.f32.gmra.mrb[22].mxu0 %vm777_vm1, %v5577_v52 }
 0x2b0   : > { %4026 = vmatprep.mubr.msk.f32.mxu0 %vm777_vm1, %v5583_v34 }
 0x2b3   : > { %4027 = vmatmul.mubr.msk.f32.gmra.mrb[24].mxu0 %vm777_vm1, %v5594_v16 }
 0x362   : > { %v4146_v21 = vpop.f32.mrb[10].mxu1 }
 0x363   : > { %v2883_v63 = vpop.f32.mrb[11].mxu1 }
 0x366   : > { %v4149_v24 = vpop.f32.mrb[12].mxu1 }
 0x367   : > { %v2893_v27 = vpop.f32.mrb[13].mxu1 }
 0x36a   : > { %v4005_v53 = vpop.f32.mrb[26].mxu0  ;;  %v4152_v54 = vpop.f32.mrb[14].mxu1 }
 0x36b   : > { %v1901_v3 = vpop.f32.mrb[27].mxu0  ;;  %v2903_v25 = vpop.f32.mrb[15].mxu1 }
 0x36e   : > { %v4008_v30 = vpop.f32.mrb[28].mxu0  ;;  %v4155_v62 = vpop.f32.mrb[16].mxu1 }
 0x36f   : > { %v1911_v60 = vpop.f32.mrb[29].mxu0  ;;  %v2913_v49 = vpop.f32.mrb[17].mxu1 }
 0x372   : > { %v4011_v41 = vpop.f32.mrb[30].mxu0  ;;  %v4158_v11 = vpop.f32.mrb[18].mxu1 }
 0x373   : > { %v1921_v5 = vpop.f32.mrb[31].mxu0  ;;  %v2923_v14 = vpop.f32.mrb[19].mxu1 }
 0x376   : > { %v4016_v59 = vpop.f32.mrb[16].mxu0  ;;  %v4161_v13 = vpop.f32.mrb[4].mxu1 }
 0x377   : > { %v4204_v8 = vadd.f32 %v4146_v21, %v4016_v59  ;;  %v4214_v7 = vadd.f32 %v4161_v13, %v4005_v53  ;;  %v2023_v20 = vpop.f32.mrb[17].mxu0  ;;  %v2933_v4 = vpop.f32.mrb[5].mxu1 }
 0x378   : > { %v4205_v2 = vadd.f32 %v2883_v63, %v2023_v20  ;;  %v4215_v52 = vadd.f32 %v2933_v4, %v1901_v3 }
 0x379   : > { %v2986_v34 = vmul.f32 %v4204_v8, %v5819_v18 }
 0x37a   : > { %v2985_v50 = vmul.f32 %v4205_v2, %v5819_v18  ;;  %v4019_v16 = vpop.f32.mrb[18].mxu0  ;;  %v4164_v45 = vpop.f32.mrb[6].mxu1  ;;  %v2995_v3 = vmul.f32 %v4215_v52, %v5819_v18 }
 0x37b   : > { %v3009_v17 = vadd.f32 %v5824_v12, %v2986_v34  ;;  %v4206_v1 = vadd.f32 %v4149_v24, %v4019_v16  ;;  %v4216_v15 = vadd.f32 %v4164_v45, %v4008_v30  ;;  %v2033_v10 = vpop.f32.mrb[19].mxu0  ;;  %v2943_v28 = vpop.f32.mrb[7].mxu1 }
 0x37c   : > { %v4207_v39 = vadd.f32 %v2893_v27, %v2033_v10  ;;  %v4217_v33 = vadd.f32 %v2943_v28, %v1911_v60  ;;  %v3008_v46 = vadd.f32 %v5824_v12, %v2985_v50  ;;  %v3018_v13 = vadd.f32 %v5824_v12, %v2995_v3 }
 0x37d   : > { %v2988_v9 = vmul.f32 %v4206_v1, %v5819_v18  ;;  %v3025_v58 = vmax.f32 %v3009_v17, 0.0  ;;  %v2998_v20 = vmul.f32 %v4216_v15, %v5819_v18 }
 0x37e   : > { %v2987_v40 = vmul.f32 %v4207_v39, %v5819_v18  ;;  %v4022_v6 = vpop.f32.mrb[20].mxu0  ;;  %v4167_v29 = vpop.f32.mrb[8].mxu1  ;;  %v3024_v31 = vmax.f32 %v3008_v46, 0.0  ;;  %v2997_v59 = vmul.f32 %v4217_v33, %v5819_v18  ;;  %v3034_v52 = vmax.f32 %v3018_v13, 0.0  ;;  %v5882_v46 = vld [vmem:[%s6137_s22] ss:$0 sm:$0xff] }
 0x37f   : > { %v4208_v35 = vadd.f32 %v4152_v54, %v4022_v6  ;;  %v4218_v36 = vadd.f32 %v4167_v29, %v4011_v41  ;;  %v2043_v57 = vpop.f32.mrb[21].mxu0  ;;  %v2953_v37 = vpop.f32.mrb[9].mxu1  ;;  %v3011_v38 = vadd.f32 %v5824_v12, %v2988_v9  ;;  %v2996_v41 = vmul.f32 %v4214_v7, %v5819_v18 }
 0x380   : > { %v4209_v43 = vadd.f32 %v2903_v25, %v2043_v57  ;;  %v4219_v44 = vadd.f32 %v2953_v37, %v1921_v5  ;;  %4170 = vmatprep.mubr.msk.f32.mxu0 %vm777_vm1, %v3024_v31  ;;  %v3010_v55 = vadd.f32 %v5824_v12, %v2987_v40  ;;  %v3020_v34 = vadd.f32 %v5824_v12, %v2997_v59  ;;  %v6139_v37 = vld [vmem:[#allocation23_spill] sm:$0xff]  ;;  %v6144_v59 = vld [vmem:[#allocation30_spill] sm:$0xff] }
 0x381   : > { %v2990_v47 = vmul.f32 %v4208_v35, %v5819_v18  ;;  %4171 = vmatmul.mubr.msk.f32.vlgmr.msra.gmra.mrb[32].mxu0 %vm777_vm1, %v3025_v58  ;;  %v3027_v22 = vmax.f32 %v3011_v38, 0.0  ;;  %v3019_v2 = vadd.f32 %v5824_v12, %v2996_v41  ;;  %v3000_v50 = vmul.f32 %v4218_v36, %v5819_v18  ;;  %v6138_v58 = vld [vmem:[#allocation24_spill] sm:$0xff] }
 0x382   : > { %v2989_v48 = vmul.f32 %v4209_v43, %v5819_v18  ;;  %v4025_v51 = vpop.f32.mrb[22].mxu0  ;;  %v3026_v56 = vmax.f32 %v3010_v55, 0.0  ;;  %v2999_v7 = vmul.f32 %v4219_v44, %v5819_v18  ;;  %v3021_v45 = vadd.f32 %v5824_v12, %v2998_v20  ;;  %v6145_v20 = vld [vmem:[#allocation29_spill] sm:$0xff] }
 0x383   : > { %v4210_v61 = vadd.f32 %v4155_v62, %v4025_v51  ;;  %v2053_v0 = vpop.f32.mrb[23].mxu0  ;;  %v3013_v23 = vadd.f32 %v5824_v12, %v2990_v47  ;;  %v3035_v16 = vmax.f32 %v3019_v2, 0.0  ;;  %v3036_v17 = vmax.f32 %v3020_v34, 0.0 }
 0x384   : > { %v4211_v26 = vadd.f32 %v2913_v49, %v2053_v0  ;;  %4173 = vmatprep.mubr.msk.f32.mxu0 %vm777_vm1, %v3026_v56  ;;  %v3012_v32 = vadd.f32 %v5824_v12, %v2989_v48  ;;  %v3022_v1 = vadd.f32 %v5824_v12, %v2999_v7  ;;  %v3037_v15 = vmax.f32 %v3021_v45, 0.0  ;;  %v6140_v56 = vld [vmem:[#allocation26_spill] sm:$0xff]  ;;  %v6146_v45 = vld [vmem:[#allocation32_spill] sm:$0xff] }
 0x385   : > { %v2992_v19 = vmul.f32 %v4210_v61, %v5819_v18  ;;  %4174 = vmatmul.mubr.msk.f32.gmra.mrb[34].mxu0 %vm777_vm1, %v3027_v22  ;;  %v3029_v53 = vmax.f32 %v3013_v23, 0.0  ;;  %v3023_v10 = vadd.f32 %v5824_v12, %v3000_v50  ;;  %v6141_v23 = vld [vmem:[#allocation25_spill] sm:$0xff] }
 0x386   : > { %v2991_v42 = vmul.f32 %v4211_v26, %v5819_v18  ;;  %v4028_v21 = vpop.f32.mrb[24].mxu0  ;;  %v3028_v63 = vmax.f32 %v3012_v32, 0.0  ;;  %v3038_v28 = vmax.f32 %v3022_v1, 0.0 }
 0x387   : > { %v4212_v24 = vadd.f32 %v4158_v11, %v4028_v21  ;;  %v2063_v27 = vpop.f32.mrb[25].mxu0  ;;  %v3015_v54 = vadd.f32 %v5824_v12, %v2992_v19  ;;  %v3039_v39 = vmax.f32 %v3023_v10, 0.0  ;;  %v6147_v10 = vld [vmem:[#allocation31_spill] sm:$0xff] }
 0x388   : > { %v4213_v25 = vadd.f32 %v2923_v14, %v2063_v27  ;;  %4176 = vmatprep.mubr.msk.f32.mxu0 %vm777_vm1, %v3028_v63  ;;  %v3014_v30 = vadd.f32 %v5824_v12, %v2991_v42  ;;  %v6142_v27 = vld [vmem:[#allocation28_spill] sm:$0xff] }
 0x389   : > { %v2994_v62 = vmul.f32 %v4212_v24, %v5819_v18  ;;  %4177 = vmatmul.mubr.msk.f32.gmra.mrb[36].mxu0 %vm777_vm1, %v3029_v53  ;;  %v3031_v11 = vmax.f32 %v3015_v54, 0.0 }
 0x38a   : > { %v2993_v60 = vmul.f32 %v4213_v25, %v5819_v18  ;;  %v3030_v49 = vmax.f32 %v3014_v30, 0.0  ;;  %v5877_v18 = vld [vmem:[%s6136_s3] ss:$0 sm:$0xff]  ;;  %s4631_s3 = smov [#allocation8]  }
 0x38b   : > { %v3017_v5 = vadd.f32 %v5824_v12, %v2994_v62  ;;  %v6143_v25 = vld [vmem:[#allocation27_spill] sm:$0xff]  ;;  %s4521_s13 = sshll.u32 %s4631_s3, 4  ;;  %s4522_s13 = int_to_ptr.vmem [resolvable:$false] %s4521_s13 }
 0x38c   : > { %4179 = vmatprep.mubr.msk.f32.mxu0 %vm777_vm1, %v3030_v49  ;;  %v3016_v14 = vadd.f32 %v5824_v12, %v2993_v60  ;;  %s4523_s4 = scalar_lea.vmem %s4522_s13, 4096  ;;  %p4524_p9 = scmp.lt.s32.totalorder %s5968_s29, %s4522_s13 }
 0x38d   : > { %4180 = vmatmul.mubr.msk.f32.gmra.mrb[38].mxu0 %vm777_vm1, %v3031_v11  ;;  %v3033_v4 = vmax.f32 %v3017_v5, 0.0  ;;  %p4525_p0 = scmp.lt.s32.totalorder %s4523_s4, %s4517_s20 }
 0x38e   : > { %v3032_v8 = vmax.f32 %v3016_v14, 0.0 }
 0x38f   : > { %p4526_p11 = por %p4525_p0, %p4524_p9 }
 0x390   : > { %4182 = vmatprep.mubr.msk.f32.mxu0 %vm777_vm1, %v3032_v8 }
 0x391   : > { %4183 = vmatmul.mubr.msk.f32.gmra.mrb[40].mxu0 %vm777_vm1, %v3033_v4  ;;  %p4527_p1 = pnand %p4526_p11, %p4520_p8 }
 0x392   : > { %4185 = vmatprep.mubr.msk.f32.mxu0 %vm777_vm1, %v3034_v52 }
 0x395   : > { %4186 = vmatmul.mubr.msk.f32.gmra.mrb[42].mxu0 %vm777_vm1, %v3035_v16 }
 0x396   : > { %4188 = vmatprep.mubr.msk.f32.mxu0 %vm777_vm1, %v3036_v17 }
 0x399   : > { %4189 = vmatmul.mubr.msk.f32.gmra.mrb[44].mxu0 %vm777_vm1, %v3037_v15 }
 0x39a   : > { %4191 = vmatprep.mubr.msk.f32.mxu0 %vm777_vm1, %v3038_v28 }
 0x39d   : > { %4192 = vmatmul.mubr.msk.f32.gmra.mrb[46].mxu0 %vm777_vm1, %v3039_v39 }
 0x454   : > { %v4172_v33 = vpop.f32.mrb[32].mxu0 }
 0x455   : > { %v3245_v12 = vmul.f32 %v4172_v33, %v5877_v18  ;;  %v3158_v9 = vpop.f32.mrb[33].mxu0 }
 0x456   : > { %v3244_v40 = vmul.f32 %v5877_v18, %v3158_v9 }
 0x457   : > { %v3268_v6 = vadd.f32 %v5882_v46, %v3245_v12 }
 0x458   : > { %v3267_v29 = vadd.f32 %v5882_v46, %v3244_v40  ;;  %v4175_v31 = vpop.f32.mrb[34].mxu0 }
 0x459   : > { %v3284_v35 = vadd.f32 %v3268_v6, %v6138_v58  ;;  %v3247_v36 = vmul.f32 %v4175_v31, %v5877_v18  ;;  %v3168_v57 = vpop.f32.mrb[35].mxu0 }
 0x45a   : > { %v3283_v38 = vadd.f32 %v3267_v29, %v6139_v37  ;;  %v3246_v43 = vmul.f32 %v5877_v18, %v3168_v57  ;;  %v6148_v29 = vld [vmem:[#allocation34_spill] sm:$0xff] }
 0x45b   : > { %v3300_v44 = vmax.f32 %v3284_v35, 0.0  ;;  %v3270_v55 = vadd.f32 %v5882_v46, %v3247_v36  ;;  %v6149_v36 = vld [vmem:[#allocation33_spill] sm:$0xff] }
 0x45c   : > { %v3299_v47 = vmax.f32 %v3283_v38, 0.0  ;;  %v3269_v48 = vadd.f32 %v5882_v46, %v3246_v43  ;;  %v4178_v51 = vpop.f32.mrb[36].mxu0 }
 0x45d   : > { %3316 = vst.msk [vmem:[%s5040_s14 + $0x8] sm:$0xff] %vm521_vm0, %v3300_v44  ;;  %v3286_v61 = vadd.f32 %v3270_v55, %v6140_v56  ;;  %v3249_v0 = vmul.f32 %v4178_v51, %v5877_v18  ;;  %v3178_v22 = vpop.f32.mrb[37].mxu0 }
 0x45e   : > { %3315 = vst.msk [vmem:[%s5040_s14] sm:$0xff] %vm521_vm0, %v3299_v47  ;;  %v3285_v26 = vadd.f32 %v3269_v48, %v6141_v23  ;;  %v3248_v32 = vmul.f32 %v5877_v18, %v3178_v22  ;;  %v6150_v48 = vld [vmem:[#allocation36_spill] sm:$0xff] }
 0x45f   : > { %v3302_v19 = vmax.f32 %v3286_v61, 0.0  ;;  %v3272_v42 = vadd.f32 %v5882_v46, %v3249_v0  ;;  %v6151_v0 = vld [vmem:[#allocation35_spill] sm:$0xff] }
 0x460   : > { %v3301_v21 = vmax.f32 %v3285_v26, 0.0  ;;  %v3271_v63 = vadd.f32 %v5882_v46, %v3248_v32  ;;  %v4181_v24 = vpop.f32.mrb[38].mxu0 }
 0x461   : > { %3318 = vst.msk [vmem:[%s5040_s14 + $0x18] sm:$0xff] %vm521_vm0, %v3302_v19  ;;  %v3288_v53 = vadd.f32 %v3272_v42, %v6142_v27  ;;  %v3251_v54 = vmul.f32 %v4181_v24, %v5877_v18  ;;  %v3188_v3 = vpop.f32.mrb[39].mxu0  ;;  %v6153_v24 = vld [vmem:[#allocation37_spill] sm:$0xff] }
 0x462   : > { %3317 = vst.msk [vmem:[%s5040_s14 + $0x10] sm:$0xff] %vm521_vm0, %v3301_v21  ;;  %v3287_v30 = vadd.f32 %v3271_v63, %v6143_v25  ;;  %v3250_v62 = vmul.f32 %v5877_v18, %v3188_v3  ;;  %v6152_v21 = vld [vmem:[#allocation38_spill] sm:$0xff] }
 0x463   : > { %v3304_v60 = vmax.f32 %v3288_v53, 0.0  ;;  %v3274_v49 = vadd.f32 %v5882_v46, %v3251_v54 }
 0x464   : > { %v3303_v41 = vmax.f32 %v3287_v30, 0.0  ;;  %v3273_v11 = vadd.f32 %v5882_v46, %v3250_v62  ;;  %v4184_v5 = vpop.f32.mrb[40].mxu0 }
 0x465   : > { %3320 = vst.msk [vmem:[%s5040_s14 + $0x28] sm:$0xff] %vm521_vm0, %v3304_v60  ;;  %v3290_v14 = vadd.f32 %v3274_v49, %v6144_v59  ;;  %v3253_v13 = vmul.f32 %v4184_v5, %v5877_v18  ;;  %v3198_v8 = vpop.f32.mrb[41].mxu0 }
 0x466   : > { %3319 = vst.msk [vmem:[%s5040_s14 + $0x20] sm:$0xff] %vm521_vm0, %v3303_v41  ;;  %v3289_v4 = vadd.f32 %v3273_v11, %v6145_v20  ;;  %v3252_v2 = vmul.f32 %v5877_v18, %v3198_v8 }
 0x467   : > { %v3306_v7 = vmax.f32 %v3290_v14, 0.0  ;;  %v3276_v52 = vadd.f32 %v5882_v46, %v3253_v13 }
 0x468   : > { %v3305_v34 = vmax.f32 %v3289_v4, 0.0  ;;  %v3275_v50 = vadd.f32 %v5882_v46, %v3252_v2  ;;  %v4187_v16 = vpop.f32.mrb[42].mxu0 }
 0x469   : > { %3322 = vst.msk [vmem:[%s5040_s14 + $0x38] sm:$0xff] %vm521_vm0, %v3306_v7  ;;  %v3292_v17 = vadd.f32 %v3276_v52, %v6146_v45  ;;  %v3255_v1 = vmul.f32 %v4187_v16, %v5877_v18  ;;  %v3208_v15 = vpop.f32.mrb[43].mxu0 }
 0x46a   : > { %3321 = vst.msk [vmem:[%s5040_s14 + $0x30] sm:$0xff] %vm521_vm0, %v3305_v34  ;;  %v3291_v28 = vadd.f32 %v3275_v50, %v6147_v10  ;;  %v3254_v39 = vmul.f32 %v5877_v18, %v3208_v15 }
 0x46b   : > { %v3308_v33 = vmax.f32 %v3292_v17, 0.0  ;;  %v3278_v12 = vadd.f32 %v5882_v46, %v3255_v1 }
 0x46c   : > { %v3307_v9 = vmax.f32 %v3291_v28, 0.0  ;;  %v3277_v40 = vadd.f32 %v5882_v46, %v3254_v39  ;;  %v4190_v6 = vpop.f32.mrb[44].mxu0 }
 0x46d   : > { %3324 = vst.msk [vmem:[%s5040_s14 + $0x48] sm:$0xff] %vm521_vm0, %v3308_v33  ;;  %v3294_v31 = vadd.f32 %v3278_v12, %v6148_v29  ;;  %v3257_v58 = vmul.f32 %v4190_v6, %v5877_v18  ;;  %v3218_v35 = vpop.f32.mrb[45].mxu0 }
 0x46e   : > { %3323 = vst.msk [vmem:[%s5040_s14 + $0x40] sm:$0xff] %vm521_vm0, %v3307_v9  ;;  %v3293_v57 = vadd.f32 %v3277_v40, %v6149_v36  ;;  %v3256_v37 = vmul.f32 %v5877_v18, %v3218_v35 }
 0x46f   : > { %v3310_v38 = vmax.f32 %v3294_v31, 0.0  ;;  %v3280_v43 = vadd.f32 %v5882_v46, %v3257_v58 }
 0x470   : > { %v3309_v44 = vmax.f32 %v3293_v57, 0.0  ;;  %v3279_v55 = vadd.f32 %v5882_v46, %v3256_v37  ;;  %v4193_v47 = vpop.f32.mrb[46].mxu0 }
 0x471   : > { %3326 = vst.msk [vmem:[%s5040_s14 + $0x58] sm:$0xff] %vm521_vm0, %v3310_v38  ;;  %v3296_v51 = vadd.f32 %v3280_v43, %v6150_v48  ;;  %v3259_v56 = vmul.f32 %v4193_v47, %v5877_v18  ;;  %v3228_v61 = vpop.f32.mrb[47].mxu0 }
 0x472   : > { %3325 = vst.msk [vmem:[%s5040_s14 + $0x50] sm:$0xff] %vm521_vm0, %v3309_v44  ;;  %v3295_v22 = vadd.f32 %v3279_v55, %v6151_v0  ;;  %v3258_v23 = vmul.f32 %v5877_v18, %v3228_v61 }
 0x473   : > { %v3312_v26 = vmax.f32 %v3296_v51, 0.0  ;;  %v3282_v32 = vadd.f32 %v5882_v46, %v3259_v56 }
 0x474   : > { %v3311_v19 = vmax.f32 %v3295_v22, 0.0  ;;  %v3281_v42 = vadd.f32 %v5882_v46, %v3258_v23 }
 0x475   : > { %3328 = vst.msk [vmem:[%s5040_s14 + $0x68] sm:$0xff] %vm521_vm0, %v3312_v26  ;;  %v3298_v63 = vadd.f32 %v3282_v32, %v6152_v21 }
 0x476   : > { %3327 = vst.msk [vmem:[%s5040_s14 + $0x60] sm:$0xff] %vm521_vm0, %v3311_v19  ;;  %v3297_v27 = vadd.f32 %v3281_v42, %v6153_v24 }
 0x477   : > { %v3314_v18 = vmax.f32 %v3298_v63, 0.0 }
 0x478   : > { %v3313_v46 = vmax.f32 %v3297_v27, 0.0 }
 0x479   : > { %3330 = vst.msk [vmem:[%s5040_s14 + $0x78] sm:$0xff] %vm521_vm0, %v3314_v18 }
 0x47a   : > { %3329 = vst.msk [vmem:[%s5040_s14 + $0x70] sm:$0xff] %vm521_vm0, %v3313_v46 }
 0x47b   : > { %4530 = shalt.err (!%p4527_p1)
}
 0x47c   : > { %s4531_s14 = scalar_lea.hbm %s5966_s1, 2048  ;;  %s4535_s8 = scalar_lea.hbm %s6154_s17, 8192 }
 0x47d   : > { %p4532_p3 = scmp.ne.s32.totalorder %s5966_s1, %s4531_s14  ;;  %p4536_p12 = scmp.lt.u32.totalorder %s5966_s1, %s6154_s17 }
 0x47e   : > { %p4537_p6 = scmp.lt.u32.totalorder %s4535_s8, %s4531_s14  ;;  %p4539_p13 = scmp.lt.u32.totalorder %s4531_s14, %s5966_s1 }
 0x47f   : > { %p4533_p5 = pnand %p4532_p3, %p6155_p4 }
 0x480   : > { %p4538_p7 = por %p4537_p6, %p4536_p12 }
 0x481   : > { %p4534_p2 = pneg %p4533_p5 }
 0x482   : > { %p4540_p10 = por %p4539_p13, %p4538_p7 }
 0x484   : > { %p4541_p8 = pnand %p4540_p10, %p4534_p2 }
 0x486   : > { %4544 = shalt.err (!%p4541_p8)
}
 0x487   : > { %s4632_s21 = smov 128   ;;  %s4633_s12 = smov 8  }
 0x488   : > { %4342 = dma.vmem_to_hbm [thread:$0]  (%p6155_p4), %s5968_s29, 2048, %s5966_s1, %s3332_s18, %s4632_s21, %s4632_s21, %s4633_s12  }
 0x489 PF: > { %s6156_s20 = sld [smem:[#allocation19_spill]]  ;;  %p4357_p9 = scmp.ge.s32.totalorder %s4623_s15, 2 }
 0x48a   : > { %p6157_p0 = scmp.ne.s32.totalorder %s6094_s25, 0 }
 0x48c   : > { %p4349_p11 = pnand %p4357_p9, %p6157_p0 }
 0x48f   : > { %s3363_s3 = sand.u32 1, %s6156_s20  }
 0x490   : > { %s3364_s13 = scalar_lea.sflag [#allocation7], %s3363_s3 }
 0x491   : > { %4590 = dma.done.wait (!%p4349_p11), %s3364_s13, 2048  }
 0x492   : > { %4592 = vsyncadd (!%p4349_p11), %s3364_s13, 4294965248  ;;  %s29_s15 = sadd.s32 1, %s4623_s15   ;;  %s6158_s29 = sld [smem:[#allocation20_spill]] }
 0x493   : > { %p26_p1 = scmp.ge.s32.totalorder %s29_s15, 6   ;;  %s6159_s24 = sld [smem:[#allocation21_spill]] }
 0x494   : > { %s6160_s14 = sld [smem:[#allocation22_spill]]  ;;  %s6161_s25 = smov %s4599_s26 }
 0x495   : > { %s6162_s26 = smov %s4603_s27  ;;  %s6163_s27 = smov %s4782_s10 }
 0x496   : > { %s6164_s28 = smov %s4615_s30  ;;  %28 = sbr.rel (!%p26_p1) target bundleno = 17 (0x11), region = 151 }
 0x499   : > { %s6165_s30 = smov %s6159_s24 }
 0x49d   :  { %3369 = vsyncpa [#allocation6], 1 }
 0x49e   :  { %3371 = vsyncpa [#allocation6 + $0x1], 1 }
 0x49f   :  { %3372 = vsyncpa [#allocation7], 1 }
 0x4a0   :  { %3374 = vsyncpa [#allocation7 + $0x1], 1 }
 0x4a1   :  { %3375 = vsyncmov [#allocation4] }
 0x4a4   :  { %s3376_s9 = vpop.sfrf %3375 }
 0x4a5   :  { %p3698_p4 = scmp.ne.s32.totalorder %s3376_s9, 0 }
 0x4a7   :  { %3380 = shalt.err (%p3698_p4)  }
 0x4a8   :  { %3382 = vsyncmov [#allocation4 + $0x1] }
 0x4ab   :  { %s3383_s10 = vpop.sfrf %3382 }
 0x4ac   :  { %p3699_p3 = scmp.ne.s32.totalorder %s3383_s10, 0 }
 0x4ae   :  { %3387 = shalt.err (%p3699_p3)  }

</bundles_post_ra>
